<compile_context>
chip_gen: v6e
topology: v6e:2x2x1
jax: 0.10.0
libtpu: 0.0.40
codegen_flags: <defaults>
</compile_context>

<pallas_src>
import jax
import jax.numpy as jnp
from jax import lax
from jax.experimental import pallas as pl
from jax.experimental.pallas import tpu as pltpu


def _make_kernel(b_tile: int, L: int):
    M = b_tile * L          # rows per grid step (b_tile packed batch elements)
    H = L // 2              # pooled half-length
    Lf = float(L)

    def kernel(x_ref, w_ref, bconv_ref, wa_ref, ba_ref, pos_ref, o_ref):
        x = x_ref[...]                      # (M, CP) f32
        pos = pos_ref[...]                  # (M, 1)  f32: position l within element

        # ---- conv2(conv1(x)) as ONE effective k=5 conv + boundary fixups ----
        # Shifted copies (cyclic roll, non-negative shifts), zeroed where the
        # shifted row would cross a batch-element boundary (== conv zero pad).
        x_m1 = jnp.where(pos >= 1.0, pltpu.roll(x, shift=1, axis=0), 0.0)
        x_m2 = jnp.where(pos >= 2.0, pltpu.roll(x, shift=2, axis=0), 0.0)
        x_p1 = jnp.where(pos <= Lf - 2.0, pltpu.roll(x, shift=M - 1, axis=0), 0.0)
        x_p2 = jnp.where(pos <= Lf - 3.0, pltpu.roll(x, shift=M - 2, axis=0), 0.0)
        # Boundary-correction columns: conv2 sees h[-1]=h[L]=0, which the naive
        # k=5 composition does not; fix rows l=0 and l=L-1.
        x_f = jnp.where(pos == 0.0, x, 0.0)
        x_l = jnp.where(pos == Lf - 1.0, x, 0.0)

        xcat = jnp.concatenate([x_m2, x_m1, x, x_p1, x_p2, x_f, x_l],
                               axis=1).astype(jnp.bfloat16)        # (M, 7*CP)
        out = jnp.dot(xcat, w_ref[...],
                      preferred_element_type=jnp.float32) + bconv_ref[...]

        # ---- spatial attention: O(M) pooling via strided even/odd row reads ----
        x_even = x_ref[pl.ds(0, M // 2, stride=2), :]   # rows 0,2,4,...  (M/2, CP)
        x_odd = x_ref[pl.ds(1, M // 2, stride=2), :]    # rows 1,3,5,...
        p_avg = 0.5 * (x_even + x_odd)                  # AvgPool1d(2)
        p_max = jnp.maximum(x_even, x_odd)              # MaxPool1d(2)

        # torch.cat([avg, max], dim=L): per batch element, avg half then max
        # half (static, sublane-aligned sub-block copies; unrolled over b_tile).
        pieces = []
        for b in range(b_tile):
            pieces.append(p_avg[b * H:(b + 1) * H, :])
            pieces.append(p_max[b * H:(b + 1) * H, :])
        cat = jnp.concatenate(pieces, axis=0)           # (M, CP)

        # Conv1d(64,64,1) (block-diagonal in packed-lane layout) + sigmoid
        att = jnp.dot(cat.astype(jnp.bfloat16), wa_ref[...],
                      preferred_element_type=jnp.float32) + ba_ref[...]
        w_att = jax.nn.sigmoid(att)

        o_ref[...] = (x * w_att + out).astype(o_ref.dtype)

    return kernel


def residual_block_spatial_attention(x, params, *, b_tile=None):
    """x: (N, L, C=64) float32 (PyTorch NCL tensor permuted to NLC).

    params = (w1, b1, w2, b2, wa, ba) with conv weights in (K=3, C_in, C_out)
    layout (w[k, ci, co] == w_torch[co, ci, k]), biases (1, C), and the 1x1
    attention conv as (C_in, C_out) (wa[ci, co] == wa_torch[co, ci, 0]).
    """
    N, L, C = x.shape
    assert C == 64, "SpatialAttention fixes channels to 64"
    assert L % 2 == 0, "AvgPool1d/MaxPool1d(2) require even sequence length"
    assert N % 2 == 0, "lane packing pairs batch elements (N must be even)"
    w1, b1, w2, b2, wa, ba = params

    # ---- lane packing: 2 batch elements per 128 lanes ----
    N2 = N // 2
    CP = 2 * C
    xp = x.reshape(N2, 2, L, C).transpose(0, 2, 1, 3).reshape(N2, L, CP)

    # ---- tile selection: target ~512 rows/step, keep >=2 grid steps, M%8==0 ----
    if b_tile is None:
        b_tile = max(1, 512 // L)
    b_tile = max(1, min(b_tile, N2))
    if N2 >= 2:
        b_tile = max(1, min(b_tile, N2 // 2))   # >=2 steps -> both v7x TCs busy

    def _ok(bt):
        return (N2 % bt == 0) and (((bt * L) % 8 == 0) or bt == N2)

    while b_tile > 1 and not _ok(b_tile):
        b_tile -= 1
    if not _ok(b_tile):
        b_tile = N2                              # full extent always legal
    M = b_tile * L
    grid = (N2 // b_tile,)

    # ---- host-side weight prep (once) ----
    def bdiag(w):                                # (64,64) -> (128,128)
        z = jnp.zeros_like(w)
        return jnp.block([[w, z], [z, w]])

    # Effective k=5 taps of conv2∘conv1 (row-vector convention: h = x @ W1_k).
    taps = [
        w1[0] @ w2[0],                                   # x[l-2]
        w1[1] @ w2[0] + w1[0] @ w2[1],                   # x[l-1]
        w1[2] @ w2[0] + w1[1] @ w2[1] + w1[0] @ w2[2],   # x[l]
        w1[2] @ w2[1] + w1[1] @ w2[2],                   # x[l+1]
        w1[2] @ w2[2],                                   # x[l+2]
        -(w1[2] @ w2[0]),                                # correction @ l = 0
        -(w1[0] @ w2[2]),                                # correction @ l = L-1
    ]
    w_big = jnp.concatenate([bdiag(t) for t in taps], axis=0).astype(jnp.bfloat16)

    # Per-row bias field (includes boundary bias corrections).
    b_eff = b1 @ (w2[0] + w2[1] + w2[2]) + b2            # (1, 64)
    bc_first = b1 @ w2[0]
    bc_last = b1 @ w2[2]
    pos_l = jnp.arange(M) % L
    first = (pos_l == 0).astype(jnp.float32)[:, None]
    last = (pos_l == L - 1).astype(jnp.float32)[:, None]
    bfield = b_eff - first * bc_first - last * bc_last   # (M, 64)
    bfield = jnp.concatenate([bfield, bfield], axis=-1)  # (M, CP) f32

    waf = bdiag(wa).astype(jnp.bfloat16)                 # (CP, CP)
    baf = jnp.concatenate([ba, ba], axis=-1)             # (1, CP)
    pos = pos_l.astype(jnp.float32).reshape(M, 1)        # (M, 1)

    # ---- flattened, lane-dense I/O ----
    x2 = xp.reshape(N2 * L, CP)

    def const_spec(shape):
        return pl.BlockSpec(shape, lambda n, _r=len(shape): (0,) * _r)

    kernel = _make_kernel(b_tile, L)

    # VMEM footprint per step (f32 in/out double-buffered + bf16 weights +
    # intermediates) stays well under the default scoped limit for M <= 1024;
    # raise vmem_limit_bytes via CompilerParams if scaling M further.
    yp = pl.pallas_call(
        kernel,
        out_shape=jax.ShapeDtypeStruct((N2 * L, CP), x.dtype),
        grid=grid,
        in_specs=[
            pl.BlockSpec((M, CP), lambda n: (n, 0)),
            const_spec(w_big.shape),
            const_spec(bfield.shape),
            const_spec(waf.shape),
            const_spec(baf.shape),
            const_spec(pos.shape),
        ],
        out_specs=pl.BlockSpec((M, CP), lambda n: (n, 0)),
        compiler_params=pltpu.CompilerParams(dimension_semantics=("parallel",)),
    )(x2, w_big, bfield, waf, baf, pos)

    # ---- unpack lanes back to (N, L, C) ----
    y = yp.reshape(N2, L, 2, C).transpose(0, 2, 1, 3).reshape(N, L, C)
    return y


# ---------------- pure-JAX reference (PyTorch semantics, NCL layout) ----------------
def _ref_conv1d(x_ncl, w_kio, b, pad):
    w_oik = jnp.transpose(w_kio, (2, 1, 0))        # (C_out, C_in, K)
    y = lax.conv_general_dilated(x_ncl, w_oik, window_strides=(1,),
                                 padding=[(pad, pad)],
                                 dimension_numbers=('NCH', 'OIH', 'NCH'))
    return y + b.reshape(1, -1, 1)


def reference(x_nlc, params):
    w1, b1, w2, b2, wa, ba = params
    x = jnp.transpose(x_nlc, (0, 2, 1))            # (N, C, L)
    N, C, L = x.shape
    out = _ref_conv1d(_ref_conv1d(x, w1, b1, 1), w2, b2, 1)
    xr = x.reshape(N, C, L // 2, 2)
    avg_out = xr.mean(axis=-1)
    max_out = xr.max(axis=-1)
    cat = jnp.concatenate([avg_out, max_out], axis=2)          # (N, C, L)
    xw = jnp.einsum('ncl,co->nol', cat, wa) + ba.reshape(1, -1, 1)
    xw = jax.nn.sigmoid(xw)
    y = x * xw + out
    return jnp.transpose(y, (0, 2, 1))             # back to (N, L, C)


if __name__ == "__main__":
    # Small demo: C fixed to 64 by the module; N=32 gives grid=(2,) so both
    # v7x TensorCores get a tile even at this size.
    N, L, C = 32, 16, 64
    key = jax.random.PRNGKey(0)
    ks = jax.random.split(key, 7)

    x = jax.random.normal(ks[0], (N, L, C), dtype=jnp.float32)

    # Deterministic synthetic parameters in kernel-friendly layout.
    w1 = jax.random.normal(ks[1], (3, C, C), dtype=jnp.float32) * 0.05
    b1 = jax.random.normal(ks[2], (1, C), dtype=jnp.float32) * 0.05
    w2 = jax.random.normal(ks[3], (3, C, C), dtype=jnp.float32) * 0.05
    b2 = jax.random.normal(ks[4], (1, C), dtype=jnp.float32) * 0.05
    wa = jax.random.normal(ks[5], (C, C), dtype=jnp.float32) * 0.05
    ba = jax.random.normal(ks[6], (1, C), dtype=jnp.float32) * 0.05
    params = (w1, b1, w2, b2, wa, ba)

    out = residual_block_spatial_attention(x, params)
    out = jax.block_until_ready(out)

    ref = jax.block_until_ready(reference(x, params))
    assert out.shape == (N, L, C)
    err = float(jnp.max(jnp.abs(out - ref)))
    # bf16 MXU operands (f32 accumulation) -> relaxed tolerance vs the f32
    # reference; a real bug would show O(0.1-1) errors.
    assert err < 3e-2, f"max abs error {err}"

    print("KERNEL_OK")
</pallas_src>

<mosaic_0001>
module attributes {stable_mosaic.version = 11 : i64} {
  func.func @kernel(%arg0: i32, %arg1: memref<128x128xf32, #tpu.memory_space<vmem>>, %arg2: memref<896x128xbf16, #tpu.memory_space<vmem>>, %arg3: memref<128x128xf32, #tpu.memory_space<vmem>>, %arg4: memref<128x128xbf16, #tpu.memory_space<vmem>>, %arg5: memref<1x128xf32, #tpu.memory_space<vmem>>, %arg6: memref<128x1xf32, #tpu.memory_space<vmem>>, %arg7: memref<128x128xf32, #tpu.memory_space<vmem>>) attributes {dimension_semantics = [#tpu.dimension_semantics<parallel>], iteration_bounds = array<i64: 2>, scalar_prefetch = 0 : i64, scratch_operands = 0 : i64, tpu.core_type = #tpu.core_type<tc>, window_params = [{transform_indices = @transform_0, window_bounds = array<i64: 128, 128>}, {pipeline_mode = #tpu.pipeline_mode<synchronous>, transform_indices = @transform_1, window_bounds = array<i64: 896, 128>}, {pipeline_mode = #tpu.pipeline_mode<synchronous>, transform_indices = @transform_2, window_bounds = array<i64: 128, 128>}, {pipeline_mode = #tpu.pipeline_mode<synchronous>, transform_indices = @transform_3, window_bounds = array<i64: 128, 128>}, {pipeline_mode = #tpu.pipeline_mode<synchronous>, transform_indices = @transform_4, window_bounds = array<i64: 1, 128>}, {pipeline_mode = #tpu.pipeline_mode<synchronous>, transform_indices = @transform_5, window_bounds = array<i64: 128, 1>}, {transform_indices = @transform_6, window_bounds = array<i64: 128, 128>}]} {
    %c0 = arith.constant 0 : index
    %c0_0 = arith.constant 0 : index
    %0 = vector.load %arg1[%c0, %c0_0] : memref<128x128xf32, #tpu.memory_space<vmem>>, vector<128x128xf32>
    %c0_1 = arith.constant 0 : index
    %c0_2 = arith.constant 0 : index
    %1 = vector.load %arg6[%c0_1, %c0_2] : memref<128x1xf32, #tpu.memory_space<vmem>>, vector<128x1xf32>
    %cst = arith.constant 1.000000e+00 : f32
    %2 = vector.broadcast %cst : f32 to vector<128x1xf32>
    %3 = arith.cmpf oge, %1, %2 : vector<128x1xf32>
    %c1_i32 = arith.constant 1 : i32
    %4 = tpu.dynamic_rotate %0 by %c1_i32 dim 0 : vector<128x128xf32>, i32 -> vector<128x128xf32>
    %cst_3 = arith.constant 0.000000e+00 : f32
    %5 = vector.shape_cast %3 : vector<128x1xi1> to vector<128x1xi1>
    %6 = vector.broadcast %5 : vector<128x1xi1> to vector<128x128xi1>
    %7 = vector.broadcast %cst_3 : f32 to vector<128x128xf32>
    %8 = arith.select %6, %4, %7 : vector<128x128xi1>, vector<128x128xf32>
    %cst_4 = arith.constant 2.000000e+00 : f32
    %9 = vector.broadcast %cst_4 : f32 to vector<128x1xf32>
    %10 = arith.cmpf oge, %1, %9 : vector<128x1xf32>
    %c2_i32 = arith.constant 2 : i32
    %11 = tpu.dynamic_rotate %0 by %c2_i32 dim 0 : vector<128x128xf32>, i32 -> vector<128x128xf32>
    %cst_5 = arith.constant 0.000000e+00 : f32
    %12 = vector.shape_cast %10 : vector<128x1xi1> to vector<128x1xi1>
    %13 = vector.broadcast %12 : vector<128x1xi1> to vector<128x128xi1>
    %14 = vector.broadcast %cst_5 : f32 to vector<128x128xf32>
    %15 = arith.select %13, %11, %14 : vector<128x128xi1>, vector<128x128xf32>
    %cst_6 = arith.constant 1.400000e+01 : f32
    %16 = vector.broadcast %cst_6 : f32 to vector<128x1xf32>
    %17 = arith.cmpf ole, %1, %16 : vector<128x1xf32>
    %c127_i32 = arith.constant 127 : i32
    %18 = tpu.dynamic_rotate %0 by %c127_i32 dim 0 : vector<128x128xf32>, i32 -> vector<128x128xf32>
    %cst_7 = arith.constant 0.000000e+00 : f32
    %19 = vector.shape_cast %17 : vector<128x1xi1> to vector<128x1xi1>
    %20 = vector.broadcast %19 : vector<128x1xi1> to vector<128x128xi1>
    %21 = vector.broadcast %cst_7 : f32 to vector<128x128xf32>
    %22 = arith.select %20, %18, %21 : vector<128x128xi1>, vector<128x128xf32>
    %cst_8 = arith.constant 1.300000e+01 : f32
    %23 = vector.broadcast %cst_8 : f32 to vector<128x1xf32>
    %24 = arith.cmpf ole, %1, %23 : vector<128x1xf32>
    %c126_i32 = arith.constant 126 : i32
    %25 = tpu.dynamic_rotate %0 by %c126_i32 dim 0 : vector<128x128xf32>, i32 -> vector<128x128xf32>
    %cst_9 = arith.constant 0.000000e+00 : f32
    %26 = vector.shape_cast %24 : vector<128x1xi1> to vector<128x1xi1>
    %27 = vector.broadcast %26 : vector<128x1xi1> to vector<128x128xi1>
    %28 = vector.broadcast %cst_9 : f32 to vector<128x128xf32>
    %29 = arith.select %27, %25, %28 : vector<128x128xi1>, vector<128x128xf32>
    %cst_10 = arith.constant 0.000000e+00 : f32
    %30 = vector.broadcast %cst_10 : f32 to vector<128x1xf32>
    %31 = arith.cmpf oeq, %1, %30 : vector<128x1xf32>
    %cst_11 = arith.constant 0.000000e+00 : f32
    %32 = vector.shape_cast %31 : vector<128x1xi1> to vector<128x1xi1>
    %33 = vector.broadcast %32 : vector<128x1xi1> to vector<128x128xi1>
    %34 = vector.broadcast %cst_11 : f32 to vector<128x128xf32>
    %35 = arith.select %33, %0, %34 : vector<128x128xi1>, vector<128x128xf32>
    %cst_12 = arith.constant 1.500000e+01 : f32
    %36 = vector.broadcast %cst_12 : f32 to vector<128x1xf32>
    %37 = arith.cmpf oeq, %1, %36 : vector<128x1xf32>
    %cst_13 = arith.constant 0.000000e+00 : f32
    %38 = vector.shape_cast %37 : vector<128x1xi1> to vector<128x1xi1>
    %39 = vector.broadcast %38 : vector<128x1xi1> to vector<128x128xi1>
    %40 = vector.broadcast %cst_13 : f32 to vector<128x128xf32>
    %41 = arith.select %39, %0, %40 : vector<128x128xi1>, vector<128x128xf32>
    %42 = tpu.concatenate %15, %8, %0, %22, %29, %35, %41 in 1 : vector<128x128xf32>, vector<128x128xf32>, vector<128x128xf32>, vector<128x128xf32>, vector<128x128xf32>, vector<128x128xf32>, vector<128x128xf32> -> vector<128x896xf32>
    %43 = arith.truncf %42 : vector<128x896xf32> to vector<128x896xbf16>
    %c0_14 = arith.constant 0 : index
    %c0_15 = arith.constant 0 : index
    %44 = vector.load %arg2[%c0_14, %c0_15] : memref<896x128xbf16, #tpu.memory_space<vmem>>, vector<896x128xbf16>
    %cst_16 = arith.constant dense<0.000000e+00> : vector<128x128xf32>
    %45 = tpu.matmul %43, %44, %cst_16 {dimension_numbers = #tpu.dot_dimension_numbers<[1], [0], [0], [1], [0, 0, 1, 1], [], []>} : vector<128x896xbf16>, vector<896x128xbf16>, vector<128x128xf32> -> vector<128x128xf32>
    %c0_17 = arith.constant 0 : index
    %c0_18 = arith.constant 0 : index
    %46 = vector.load %arg3[%c0_17, %c0_18] : memref<128x128xf32, #tpu.memory_space<vmem>>, vector<128x128xf32>
    %47 = arith.addf %45, %46 : vector<128x128xf32>
    %c0_19 = arith.constant 0 : index
    %c0_20 = arith.constant 0 : index
    %48 = tpu.strided_load %arg1[%c0_19, %c0_20] {strides = array<i32: 2, 1>} : memref<128x128xf32, #tpu.memory_space<vmem>>, vector<64x128xf32>
    %c1 = arith.constant 1 : index
    %c0_21 = arith.constant 0 : index
    %49 = tpu.strided_load %arg1[%c1, %c0_21] {strides = array<i32: 2, 1>} : memref<128x128xf32, #tpu.memory_space<vmem>>, vector<64x128xf32>
    %50 = arith.addf %48, %49 : vector<64x128xf32>
    %cst_22 = arith.constant 5.000000e-01 : f32
    %51 = vector.broadcast %cst_22 : f32 to vector<64x128xf32>
    %52 = arith.mulf %51, %50 : vector<64x128xf32>
    %53 = arith.maximumf %48, %49 : vector<64x128xf32>
    %54 = vector.extract_strided_slice %52 {offsets = [0, 0], sizes = [8, 128], strides = [1, 1]} : vector<64x128xf32> to vector<8x128xf32>
    %55 = vector.extract_strided_slice %53 {offsets = [0, 0], sizes = [8, 128], strides = [1, 1]} : vector<64x128xf32> to vector<8x128xf32>
    %56 = vector.extract_strided_slice %52 {offsets = [8, 0], sizes = [8, 128], strides = [1, 1]} : vector<64x128xf32> to vector<8x128xf32>
    %57 = vector.extract_strided_slice %53 {offsets = [8, 0], sizes = [8, 128], strides = [1, 1]} : vector<64x128xf32> to vector<8x128xf32>
    %58 = vector.extract_strided_slice %52 {offsets = [16, 0], sizes = [8, 128], strides = [1, 1]} : vector<64x128xf32> to vector<8x128xf32>
    %59 = vector.extract_strided_slice %53 {offsets = [16, 0], sizes = [8, 128], strides = [1, 1]} : vector<64x128xf32> to vector<8x128xf32>
    %60 = vector.extract_strided_slice %52 {offsets = [24, 0], sizes = [8, 128], strides = [1, 1]} : vector<64x128xf32> to vector<8x128xf32>
    %61 = vector.extract_strided_slice %53 {offsets = [24, 0], sizes = [8, 128], strides = [1, 1]} : vector<64x128xf32> to vector<8x128xf32>
    %62 = vector.extract_strided_slice %52 {offsets = [32, 0], sizes = [8, 128], strides = [1, 1]} : vector<64x128xf32> to vector<8x128xf32>
    %63 = vector.extract_strided_slice %53 {offsets = [32, 0], sizes = [8, 128], strides = [1, 1]} : vector<64x128xf32> to vector<8x128xf32>
    %64 = vector.extract_strided_slice %52 {offsets = [40, 0], sizes = [8, 128], strides = [1, 1]} : vector<64x128xf32> to vector<8x128xf32>
    %65 = vector.extract_strided_slice %53 {offsets = [40, 0], sizes = [8, 128], strides = [1, 1]} : vector<64x128xf32> to vector<8x128xf32>
    %66 = vector.extract_strided_slice %52 {offsets = [48, 0], sizes = [8, 128], strides = [1, 1]} : vector<64x128xf32> to vector<8x128xf32>
    %67 = vector.extract_strided_slice %53 {offsets = [48, 0], sizes = [8, 128], strides = [1, 1]} : vector<64x128xf32> to vector<8x128xf32>
    %68 = vector.extract_strided_slice %52 {offsets = [56, 0], sizes = [8, 128], strides = [1, 1]} : vector<64x128xf32> to vector<8x128xf32>
    %69 = vector.extract_strided_slice %53 {offsets = [56, 0], sizes = [8, 128], strides = [1, 1]} : vector<64x128xf32> to vector<8x128xf32>
    %70 = tpu.concatenate %54, %55, %56, %57, %58, %59, %60, %61, %62, %63, %64, %65, %66, %67, %68, %69 in 0 : vector<8x128xf32>, vector<8x128xf32>, vector<8x128xf32>, vector<8x128xf32>, vector<8x128xf32>, vector<8x128xf32>, vector<8x128xf32>, vector<8x128xf32>, vector<8x128xf32>, vector<8x128xf32>, vector<8x128xf32>, vector<8x128xf32>, vector<8x128xf32>, vector<8x128xf32>, vector<8x128xf32>, vector<8x128xf32> -> vector<128x128xf32>
    %71 = arith.truncf %70 : vector<128x128xf32> to vector<128x128xbf16>
    %c0_23 = arith.constant 0 : index
    %c0_24 = arith.constant 0 : index
    %72 = vector.load %arg4[%c0_23, %c0_24] : memref<128x128xbf16, #tpu.memory_space<vmem>>, vector<128x128xbf16>
    %cst_25 = arith.constant dense<0.000000e+00> : vector<128x128xf32>
    %73 = tpu.matmul %71, %72, %cst_25 {dimension_numbers = #tpu.dot_dimension_numbers<[1], [0], [0], [1], [0, 0, 1, 1], [], []>} : vector<128x128xbf16>, vector<128x128xbf16>, vector<128x128xf32> -> vector<128x128xf32>
    %c0_26 = arith.constant 0 : index
    %c0_27 = arith.constant 0 : index
    %74 = vector.load %arg5[%c0_26, %c0_27] : memref<1x128xf32, #tpu.memory_space<vmem>>, vector<1x128xf32>
    %75 = vector.broadcast %74 : vector<1x128xf32> to vector<128x128xf32>
    %76 = arith.addf %73, %75 : vector<128x128xf32>
    %77 = arith.negf %76 : vector<128x128xf32>
    %78 = math.exp %77 : vector<128x128xf32>
    %cst_28 = arith.constant 1.000000e+00 : f32
    %79 = vector.broadcast %cst_28 : f32 to vector<128x128xf32>
    %80 = arith.addf %79, %78 : vector<128x128xf32>
    %81 = arith.divf %79, %80 : vector<128x128xf32>
    %82 = arith.mulf %0, %81 : vector<128x128xf32>
    %83 = arith.addf %82, %47 : vector<128x128xf32>
    %c0_29 = arith.constant 0 : index
    %c0_30 = arith.constant 0 : index
    %84 = vector.load %arg7[%c0_29, %c0_30] : memref<128x128xf32, #tpu.memory_space<vmem>>, vector<128x128xf32>
    tpu.vector_store %arg7[%c0_29, %c0_30], %83 {strides = array<i32>} : memref<128x128xf32, #tpu.memory_space<vmem>>, vector<128x128xf32>,
    return
  }
  func.func @transform_0(%arg0: i32) -> (i32, i32) {
    %c0_i32 = arith.constant 0 : i32
    %c0_i32_0 = arith.constant 0 : i32
    return %arg0, %c0_i32 : i32, i32
  }
  func.func @transform_1(%arg0: i32) -> (i32, i32) {
    %c0_i32 = arith.constant 0 : i32
    %c0_i32_0 = arith.constant 0 : i32
    %c0_i32_1 = arith.constant 0 : i32
    return %c0_i32, %c0_i32_0 : i32, i32
  }
  func.func @transform_2(%arg0: i32) -> (i32, i32) {
    %c0_i32 = arith.constant 0 : i32
    %c0_i32_0 = arith.constant 0 : i32
    %c0_i32_1 = arith.constant 0 : i32
    return %c0_i32, %c0_i32_0 : i32, i32
  }
  func.func @transform_3(%arg0: i32) -> (i32, i32) {
    %c0_i32 = arith.constant 0 : i32
    %c0_i32_0 = arith.constant 0 : i32
    %c0_i32_1 = arith.constant 0 : i32
    return %c0_i32, %c0_i32_0 : i32, i32
  }
  func.func @transform_4(%arg0: i32) -> (i32, i32) {
    %c0_i32 = arith.constant 0 : i32
    %c0_i32_0 = arith.constant 0 : i32
    %c0_i32_1 = arith.constant 0 : i32
    return %c0_i32, %c0_i32_0 : i32, i32
  }
  func.func @transform_5(%arg0: i32) -> (i32, i32) {
    %c0_i32 = arith.constant 0 : i32
    %c0_i32_0 = arith.constant 0 : i32
    %c0_i32_1 = arith.constant 0 : i32
    return %c0_i32, %c0_i32_0 : i32, i32
  }
  func.func @transform_6(%arg0: i32) -> (i32, i32) {
    %c0_i32 = arith.constant 0 : i32
    %c0_i32_0 = arith.constant 0 : i32
    return %arg0, %c0_i32 : i32, i32
  }
}

</mosaic_0001>

<bundles_post_ra>
// kernel: tpu_custom_call.1
= control target key start
LH: loop header
LB: loop body
LE: loop exit
PB: predicated region body
PF: predicated region fallthrough
CT: control target
= control target key end

     0   :  { %11 = vsyncpa [#allocation3], 0  ;;  %s4735_s0 = inlined_call_operand.hbm [shape: f32[256,128], index: 0, kind: input, shape index: {}]   ;;  %s4736_s1 = inlined_call_operand.hbm [shape: bf16[896,128], index: 1, kind: input, shape index: {}]   ;;  %s4737_s2 = inlined_call_operand.vmem [shape: f32[128,128], index: 2, kind: input, shape index: {}]   ;;  %s4738_s3 = inlined_call_operand.hbm [shape: bf16[128,128], index: 3, kind: input, shape index: {}]   ;;  %s4739_s4 = inlined_call_operand.vmem [shape: f32[1,128], index: 4, kind: input, shape index: {}]   ;;  %s4740_s5 = inlined_call_operand.vmem [shape: f32[128,1], index: 5, kind: input, shape index: {}]   ;;  %s4741_s6 = inlined_call_operand.hbm [shape: f32[256,128], index: 6, kind: output, shape index: {}]  }
   0x1   :  { %13 = vsyncpa [#allocation3 + $0x1], 0 }
   0x2   :  { %14 = vsyncpa [#allocation6], 0 }
   0x3   :  { %15 = vsyncpa [#allocation4], 0 }
   0x4   :  { %17 = vsyncpa [#allocation4 + $0x1], 0  ;;  %s3505_s21 = smov 0   ;;  %s3507_s22 = smov 0  }
   0x5   :  { %s3509_s23 = smov 0   ;;  %s3511_s24 = smov 0  }
   0x6 LB: > { %s3526_s25 = sadd.s32 4294967295, %s3457_s24   ;;  %s2529_s26 = sadd.s32 4294967294, %s3457_s24   ;;  %s3457_s24 = sphi %s3511_s24, %s4784_s24   ;;  %s3453_s23 = sphi %s3509_s23, %s4783_s23   ;;  %s3449_s22 = sphi %s3507_s22, %s4782_s22   ;;  %s3445_s21 = sphi %s3505_s21, %s4781_s21  }
   0x7   : > { %p43_p0 = scmp.ne.s32.totalorder %s3449_s22, %s3445_s21  ;;  %p4742_p1 = scmp.eq.s32.totalorder %s3526_s25, 0 }
   0x8   : > { %p178_p3 = scmp.eq.s32.totalorder %s2529_s26, 1  ;;  %p2530_p5 = scmp.ge.s32.totalorder %s3457_s24, 1 }
   0x9   : > { %p3535_p4 = por %p4742_p1, %p43_p0  ;;  %p185_p7 = scmp.lt.s32.totalorder %s3457_s24, 3 }
   0xa   : > { %p3540_p6 = por %p178_p3, %p43_p0  ;;  %s3459_s30 = smov [#allocation5]  }
   0xb   : > { %s4749_s27 = scalar_select %p3535_p4, 1, 0 }
   0xc   : > { %s4750_s28 = scalar_select %p3540_p6, 1, 0 }
   0xd   : > { %p3545_p8 = pnand %p2530_p5, %p185_p7  ;;  %s197_s7 = sshll.u32 %s3459_s30, 4  ;;  %s198_s7 = int_to_ptr.vmem [resolvable:$true] %s197_s7 }
   0xe   : > { %s3460_s9 = smov [#allocation7]   ;;  %s3320_s11 = scalar_lea.vmem %s198_s7, 7168 }
   0xf   : > { %s4751_s29 = scalar_select %p3545_p8, 1, 0 }
  0x10   : > { %p3089_p9 = pneg %p3545_p8  ;;  %s213_s10 = sshll.u32 %s3460_s9, 4  ;;  %s214_s10 = int_to_ptr.vmem [resolvable:$true] %s213_s10 }
  0x11   : > { %p3321_p13 = scmp.ne.s32.totalorder %s198_s7, %s3320_s11  ;;  %p3328_p5 = scmp.lt.s32.totalorder %s198_s7, %s198_s7 }
  0x12   : > { %p3554_p11 = pnand %p3089_p9, %p4742_p1  ;;  %p3329_p7 = scmp.lt.s32.totalorder %s3320_s11, %s3320_s11 }
  0x14   : > { %p3311_p12 = pneg %p3554_p11  ;;  %p3330_p10 = por %p3329_p7, %p3328_p5 }
  0x16   : > { %p3323_p0 = pnand %p3321_p13, %p3311_p12 }
  0x18   : > { %p3324_p3 = pneg %p3323_p0 }
  0x1a   : > { %p3331_p9 = pnand %p3330_p10, %p3324_p3 }
  0x1c   : > { %3334 = shalt.err (!%p3331_p9)
}
  0x1d   : > { %s3461_s12 = smov 64   ;;  %s3462_s13 = smov 4  }
  0x1e   : > { %3092 = dma.hbm_to_vmem [thread:$0]  (!%p3554_p11), %s4736_s1, 7168, %s198_s7, [#allocation6], %s3461_s12, %s3461_s12, %s3462_s13  }
  0x1f   : > { %s3346_s16 = scalar_lea.vmem %s214_s10, 1024  ;;  %p3354_p2 = scmp.lt.s32.totalorder %s214_s10, %s214_s10 }
  0x20   : > { %p3347_p1 = scmp.ne.s32.totalorder %s214_s10, %s3346_s16  ;;  %p3355_p6 = scmp.lt.s32.totalorder %s3346_s16, %s3346_s16 }
  0x22   : > { %p3349_p13 = pnand %p3347_p1, %p3311_p12  ;;  %p3356_p5 = por %p3355_p6, %p3354_p2 }
  0x24   : > { %p3350_p0 = pneg %p3349_p13 }
  0x26   : > { %p3357_p10 = pnand %p3356_p5, %p3350_p0 }
  0x28   : > { %3360 = shalt.err (!%p3357_p10)
}
  0x29   : > { %3095 = dma.hbm_to_vmem [thread:$0]  (!%p3554_p11), %s4738_s3, 1024, %s214_s10, [#allocation6], %s3461_s12, %s3461_s12, %s3462_s13  }
  0x2a   : > { %s3577_s19 = sadd.s32 1, %s3457_s24   ;;  %s30_s20 = sadd.s32 1, %s3453_s23 }
  0x2b   : > { %s27_s26 = ssub.s32 %s3457_s24, %s3577_s19  ;;  %p37_p1 = scmp.ne.s32.totalorder %s3453_s23, %s3449_s22 }
  0x2c   : > { %p28_p2 = scmp.eq.s32.totalorder %s27_s26, 0  ;;  %p38_p6 = scmp.eq.s32.totalorder %s3457_s24, 0 }
  0x2d   : > { %p4753_p12 = scmp.eq.s32.totalorder %s3526_s25, 1  ;;  %p3106_p7 = scmp.lt.s32.totalorder %s3457_s24, 2 }
  0x2e   : > { %s3593_s7 = scalar_select %p28_p2, %s3453_s23, %s30_s20  }
  0x2f   : > { %p3587_p3 = por %p4753_p12, %p37_p1  ;;  %p39_p9 = por %p38_p6, %p37_p1 }
  0x30   : > { %s233_s8 = sand.u32 1, %s3453_s23   ;;  %s2787_s10 = sshll.u32 %s3457_s24, 11 }
  0x31   : > { %s4754_s30 = scalar_select %p3587_p3, 1, 0 }
  0x32   : > { %s2534_s9 = sshll.u32 %s233_s8, 7  ;;  %s3600_s13 = scalar_lea.hbm %s4735_s0, %s2787_s10 }
  0x33   : > { %s237_s14 = scalar_lea.vmem [#allocation2], %s2534_s9  ;;  %p3604_p11 = pnand %p3106_p7, %p39_p9 }
  0x34   : > { %s244_s15 = sshll.u32 %s237_s14, 4  ;;  %s3608_s17 = scalar_lea.sflag [#allocation3], %s233_s8  ;;  %s3602_s15 = int_to_ptr.vmem [resolvable:$true] %s244_s15 }
  0x35   : > { %s3361_s18 = scalar_lea.hbm %s3600_s13, 2048  ;;  %p3363_p0 = pneg %p3604_p11 }
  0x36   : > { %p3362_p13 = scmp.ne.s32.totalorder %s3600_s13, %s3361_s18  ;;  %s3366_s9 = scalar_lea.hbm %s4735_s0, 4096 }
  0x37   : > { %p3367_p1 = scmp.lt.s32.totalorder %s3600_s13, %s4735_s0  ;;  %p3368_p2 = scmp.lt.s32.totalorder %s3366_s9, %s3361_s18 }
  0x38   : > { %p3364_p5 = pnand %p3363_p0, %p3362_p13 }
  0x39   : > { %p3369_p6 = por %p3368_p2, %p3367_p1 }
  0x3a   : > { %p3365_p10 = pneg %p3364_p5 }
  0x3c   : > { %p3370_p12 = pnand %p3369_p6, %p3365_p10 }
  0x3e   : > { %3373 = shalt.err (!%p3370_p12)
}
  0x3f   : > { %s3374_s8 = scalar_lea.vmem %s3602_s15, 2048  ;;  %s3463_s12 = smov [#allocation2]  }
  0x40   : > { %p3375_p7 = scmp.ne.s32.totalorder %s3602_s15, %s3374_s8  ;;  %s3379_s14 = sshll.u32 %s3463_s12, 4  ;;  %s3380_s14 = int_to_ptr.vmem [resolvable:$false] %s3379_s14 }
  0x41   : > { %s3381_s20 = scalar_lea.vmem %s3380_s14, 4096  ;;  %p3382_p5 = scmp.lt.s32.totalorder %s3602_s15, %s3380_s14 }
  0x42   : > { %p3377_p9 = pnand %p3375_p7, %p3363_p0  ;;  %p3383_p3 = scmp.lt.s32.totalorder %s3381_s20, %s3374_s8 }
  0x44   : > { %p3378_p13 = pneg %p3377_p9  ;;  %p3384_p4 = por %p3383_p3, %p3382_p5 }
  0x46   : > { %p3385_p8 = pnand %p3384_p4, %p3378_p13 }
  0x48   : > { %3388 = shalt.err (!%p3385_p8)
}
  0x49   : > { %s3464_s18 = smov 128   ;;  %s3465_s26 = smov 8  }
  0x4a   : > { %3099 = dma.hbm_to_vmem [thread:$0]  (!%p3604_p11), %s3600_s13, 2048, %s3602_s15, %s3608_s17, %s3464_s18, %s3464_s18, %s3465_s26  }
  0x4b   : > { %p4756_p0 = scmp.ne.s32.totalorder %s4751_s29, 0 }
  0x4d   : > { %256 = sbr.rel (%p4756_p0) target bundleno = 628 (0x274), region = 44 }
  0x52   : > { %s3632_s9 = sand.u32 1, %s3449_s22   ;;  %p4757_p4 = scmp.ne.s32.totalorder %s4749_s27, 0 }
  0x53   : > { %s2538_s10 = sshll.u32 %s3632_s9, 7  ;;  %s259_s11 = scalar_lea.sflag [#allocation3], %s3632_s9 }
  0x54   : > { %s3638_s8 = scalar_lea.vmem [#allocation2], %s2538_s10 }
  0x55   : > { %3432 = dma.done.wait (%p4757_p4), %s259_s11, 2048  }
  0x56   : > { %3434 = vsyncadd (%p4757_p4), %s259_s11, 4294965248  ;;  %p4758_p8 = scmp.eq.s32.totalorder %s3526_s25, 0 }
  0x58   : > { %3436 = dma.done.wait (%p4758_p8), [#allocation6], 8192   ;;  %p4759_p3 = pmov %p4758_p8 }
  0x59   : > { %v3466_v0 = vmov 0   ;;  %v3653_v1 = vld [vmem:[%s4740_s5 + $0x10] sm:$0xff]  ;;  %v3658_v2 = vld [vmem:[%s4740_s5] sm:$0xff]  ;;  %v3663_v3 = vld [vmem:[%s4740_s5 + $0x18] sm:$0xff]  ;;  %s4615_s15 = scalar_lea.vmem [#allocation8], %s2538_s10  ;;  %p4778_p10 = scmp.ne.s32.totalorder %s4754_s30, 0 }
  0x5a   : > { %3438 = vsyncadd (%p4759_p3), [#allocation6], 4294959104  ;;  %3152 = vset.pattern.permute.xlu1 %v3466_v0  ;;  %3151 = vset.pattern.permute.xlu0 %v3466_v0  ;;  %vm628_vm0 = vcmp.le.f32.partialorder %v3653_v1, 14.0  ;;  %vm626_vm1 = vcmp.le.f32.partialorder %v3658_v2, 14.0  ;;  %vm629_vm2 = vcmp.le.f32.partialorder %v3663_v3, 14.0  ;;  %v3671_v4 = vld [vmem:[%s4740_s5 + $0x8] sm:$0xff] }
  0x5b   : > { %v677_v5 = vsel %vm628_vm0, 1, %v3466_v0  ;;  %v675_v6 = vsel %vm626_vm1, 1, %v3466_v0  ;;  %vm627_vm3 = vcmp.le.f32.partialorder %v3671_v4, 14.0  ;;  %v3679_v7 = vld [vmem:[%s4740_s5 + $0x28] sm:$0xff]  ;;  %v3684_v8 = vld [vmem:[%s4740_s5 + $0x20] sm:$0xff]  ;;  %v678_v9 = vsel %vm629_vm2, 1, %v3466_v0 }
  0x5c   : > { %698 = vperm.xlu1 %3152, %v677_v5   ;;  %692 = vperm.xlu0 %3151, %v675_v6   ;;  %v676_v10 = vsel %vm627_vm3, 1, %v3466_v0  ;;  %vm631_vm4 = vcmp.le.f32.partialorder %v3679_v7, 14.0  ;;  %vm630_vm5 = vcmp.le.f32.partialorder %v3684_v8, 14.0  ;;  %v3693_v11 = vld [vmem:[%s4740_s5 + $0x38] sm:$0xff]  ;;  %v3698_v12 = vld [vmem:[%s4740_s5 + $0x30] sm:$0xff]  ;;  %vm335_vm8 = vcmp.ge.f32.partialorder %v3671_v4, 1.0 }
  0x5d   : > { %v680_v13 = vsel %vm631_vm4, 1, %v3466_v0  ;;  %v679_v14 = vsel %vm630_vm5, 1, %v3466_v0  ;;  %vm633_vm6 = vcmp.le.f32.partialorder %v3693_v11, 14.0  ;;  %vm632_vm7 = vcmp.le.f32.partialorder %v3698_v12, 14.0  ;;  %v3153_v15 = vld [vmem:[#allocation5 + $0xf8] sm:$0xff]   ;;  %v3155_v19 = vld [vmem:[#allocation5 + $0xf0] sm:$0xff]  }
  0x5e   : > { %v3154_v16 = vld [vmem:[#allocation5 + $0xb8] sm:$0xff]   ;;  %v682_v17 = vsel %vm633_vm6, 1, %v3466_v0  ;;  %v681_v18 = vsel %vm632_vm7, 1, %v3466_v0  ;;  %2853 = vmatprep.subr.bf16.mxu1 %v3153_v15  ;;  %vm334_vm9 = vcmp.ge.f32.partialorder %v3658_v2, 1.0  ;;  %v3156_v20 = vld [vmem:[#allocation5 + $0xb0] sm:$0xff]   ;;  %v386_v21 = vsel %vm335_vm8, 1, %v3466_v0 }
  0x5f   : > { %2854 = vmatpush3.bf16.msra.mxu1 %v3154_v16  ;;  %v385_v22 = vsel %vm334_vm9, 1, %v3466_v0  ;;  %vm482_vm10 = vcmp.ge.f32.partialorder %v3671_v4, 2.0  ;;  %vm481_vm11 = vcmp.ge.f32.partialorder %v3658_v2, 2.0  ;;  %v3715_v23 = vld [vmem:[%s4740_s5 + $0x48] sm:$0xff]  ;;  %v3720_v24 = vld [vmem:[%s4740_s5 + $0x40] sm:$0xff]  ;;  %vm337_vm14 = vcmp.ge.f32.partialorder %v3663_v3, 1.0 }
  0x60   : > { %701 = vperm.xlu1 %3152, %v678_v9   ;;  %695 = vperm.xlu0 %3151, %v676_v10   ;;  %v3157_v25 = vld [vmem:[#allocation5 + $0xe8] sm:$0xff]   ;;  %v531_v27 = vsel %vm482_vm10, 1, %v3466_v0  ;;  %v530_v28 = vsel %vm481_vm11, 1, %v3466_v0  ;;  %vm635_vm12 = vcmp.le.f32.partialorder %v3715_v23, 14.0  ;;  %vm634_vm13 = vcmp.le.f32.partialorder %v3720_v24, 14.0  ;;  %v3159_v31 = vld [vmem:[#allocation5 + $0xe0] sm:$0xff]  }
  0x61   : > { %2855 = vmatprep.subr.bf16.mxu1 %v3155_v19  ;;  %v3158_v26 = vld [vmem:[#allocation5 + $0xa8] sm:$0xff]   ;;  %v684_v29 = vsel %vm635_vm12, 1, %v3466_v0  ;;  %v683_v30 = vsel %vm634_vm13, 1, %v3466_v0  ;;  %v3160_v32 = vld [vmem:[#allocation5 + $0xa0] sm:$0xff]   ;;  %vm336_vm15 = vcmp.ge.f32.partialorder %v3653_v1, 1.0  ;;  %v3733_v33 = vld [vmem:[%s4740_s5 + $0x58] sm:$0xff] }
  0x62   : > { %v3738_v34 = vld [vmem:[%s4740_s5 + $0x50] sm:$0xff]  ;;  %v388_v35 = vsel %vm337_vm14, 1, %v3466_v0  ;;  %v387_v36 = vsel %vm336_vm15, 1, %v3466_v0  ;;  %vm484_vm0 = vcmp.ge.f32.partialorder %v3663_v3, 2.0  ;;  %vm483_vm1 = vcmp.ge.f32.partialorder %v3653_v1, 2.0  ;;  %v3161_v37 = vld [vmem:[#allocation5 + $0x78] sm:$0xff]  }
  0x63   : > { %2856 = vmatpush3.bf16.msra.mxu1 %v3156_v20  ;;  %vm637_vm2 = vcmp.le.f32.partialorder %v3733_v33, 14.0  ;;  %vm636_vm3 = vcmp.le.f32.partialorder %v3738_v34, 14.0  ;;  %v3162_v38 = vld [vmem:[#allocation5 + $0x38] sm:$0xff]   ;;  %v533_v40 = vsel %vm484_vm0, 1, %v3466_v0  ;;  %v532_v41 = vsel %vm483_vm1, 1, %v3466_v0  ;;  %2789 = vmatprep.subr.bf16.mxu0 %v3161_v37  ;;  %v3165_v43 = vld [vmem:[#allocation5 + $0x70] sm:$0xff]  }
  0x64   : > { %707 = vperm.xlu1 %3152, %v680_v13   ;;  %704 = vperm.xlu0 %3151, %v679_v14   ;;  %v3163_v39 = vld [vmem:[#allocation5 + $0xd8] sm:$0xff]   ;;  %v686_v44 = vsel %vm637_vm2, 1, %v3466_v0  ;;  %v685_v45 = vsel %vm636_vm3, 1, %v3466_v0  ;;  %v3166_v46 = vld [vmem:[#allocation5 + $0x30] sm:$0xff]   ;;  %vm339_vm4 = vcmp.ge.f32.partialorder %v3679_v7, 1.0  ;;  %vm338_vm5 = vcmp.ge.f32.partialorder %v3684_v8, 1.0 }
  0x65   : > { %2857 = vmatprep.subr.bf16.mxu1 %v3157_v25  ;;  %v3164_v42 = vld [vmem:[#allocation5 + $0x98] sm:$0xff]   ;;  %2790 = vmatpush3.bf16.msra.mxu0 %v3162_v38  ;;  %v3167_v47 = vld [vmem:[#allocation5 + $0xd0] sm:$0xff]   ;;  %vm486_vm6 = vcmp.ge.f32.partialorder %v3679_v7, 2.0  ;;  %v3169_v49 = vld [vmem:[#allocation5 + $0x68] sm:$0xff]   ;;  %v390_v50 = vsel %vm339_vm4, 1, %v3466_v0  ;;  %v389_v52 = vsel %vm338_vm5, 1, %v3466_v0 }
  0x66   : > { %2791 = vmatprep.subr.bf16.mxu0 %v3165_v43  ;;  %v3168_v48 = vld [vmem:[#allocation5 + $0x90] sm:$0xff]   ;;  %v3170_v51 = vld [vmem:[#allocation5 + $0x28] sm:$0xff]   ;;  %vm485_vm7 = vcmp.ge.f32.partialorder %v3684_v8, 2.0  ;;  %v3764_v55 = vld [vmem:[%s4740_s5 + $0x60] sm:$0xff]  ;;  %v535_v58 = vsel %vm486_vm6, 1, %v3466_v0  ;;  %vm341_vm10 = vcmp.ge.f32.partialorder %v3693_v11, 1.0 }
  0x67   : > { %2858 = vmatpush3.bf16.msra.mxu1 %v3158_v26  ;;  %v3758_v53 = vld [vmem:[%s4740_s5 + $0x68] sm:$0xff]  ;;  %v3173_v57 = vld [vmem:[#allocation5 + $0x60] sm:$0xff]   ;;  %v534_v60 = vsel %vm485_vm7, 1, %v3466_v0  ;;  %vm638_vm9 = vcmp.le.f32.partialorder %v3764_v55, 14.0  ;;  %v3177_v63 = vld [vmem:[#allocation5 + $0x58] sm:$0xff]   ;;  %vm340_vm11 = vcmp.ge.f32.partialorder %v3698_v12, 1.0 }
  0x68   : > { %713 = vperm.xlu1 %3152, %v682_v17   ;;  %710 = vperm.xlu0 %3151, %v681_v18   ;;  %v3171_v54 = vld [vmem:[#allocation5 + $0xc8] sm:$0xff]   ;;  %v3174_v59 = vld [vmem:[#allocation5 + $0x20] sm:$0xff]   ;;  %vm639_vm8 = vcmp.le.f32.partialorder %v3758_v53, 14.0  ;;  %v3178_v5 = vld [vmem:[#allocation5 + $0x18] sm:$0xff]   ;;  %v687_v9 = vsel %vm638_vm9, 1, %v3466_v0  ;;  %v392_v15 = vsel %vm341_vm10, 1, %v3466_v0 }
  0x69   : > { %2859 = vmatprep.subr.bf16.mxu1 %v3159_v31  ;;  %2792 = vmatpush3.bf16.msra.mxu0 %v3166_v46  ;;  %v3172_v56 = vld [vmem:[#allocation5 + $0x88] sm:$0xff]   ;;  %v3175_v61 = vld [vmem:[#allocation5 + $0xc0] sm:$0xff]   ;;  %v688_v6 = vsel %vm639_vm8, 1, %v3466_v0  ;;  %v3179_v10 = vld [vmem:[#allocation5 + $0x50] sm:$0xff]   ;;  %v391_v16 = vsel %vm340_vm11, 1, %v3466_v0  ;;  %vm488_vm12 = vcmp.ge.f32.partialorder %v3693_v11, 2.0 }
  0x6a   : > { %2793 = vmatprep.subr.bf16.mxu0 %v3169_v49  ;;  %v3176_v62 = vld [vmem:[#allocation5 + $0x80] sm:$0xff]   ;;  %v3180_v13 = vld [vmem:[#allocation5 + $0x10] sm:$0xff]   ;;  %v3181_v14 = vld [vmem:[#allocation5 + $0x48] sm:$0xff]   ;;  %vm487_vm13 = vcmp.ge.f32.partialorder %v3698_v12, 2.0  ;;  %vm343_vm0 = vcmp.ge.f32.partialorder %v3715_v23, 1.0  ;;  %vm342_vm1 = vcmp.ge.f32.partialorder %v3720_v24, 1.0 }
  0x6b   : > { %2860 = vmatpush3.bf16.msra.mxu1 %v3160_v32  ;;  %v3182_v17 = vld [vmem:[#allocation5 + $0x8] sm:$0xff]   ;;  %v3783_v18 = vld [vmem:[%s4740_s5 + $0x78] sm:$0xff]  ;;  %v3788_v19 = vld [vmem:[%s4740_s5 + $0x70] sm:$0xff]  ;;  %vm490_vm2 = vcmp.ge.f32.partialorder %v3715_v23, 2.0  ;;  %vm489_vm3 = vcmp.ge.f32.partialorder %v3720_v24, 2.0  ;;  %vm1029_vm4 = vcmp.eq.f32.partialorder %v3671_v4, 15.0 }
  0x6c   : > { %405 = vperm.xlu1 %3152, %v386_v21   ;;  %402 = vperm.xlu0 %3151, %v385_v22   ;;  %v3183_v20 = vld [vmem:[#allocation5 + $0x40] sm:$0xff]   ;;  %v537_v21 = vsel %vm488_vm12, 1, %v3466_v0  ;;  %v536_v22 = vsel %vm487_vm13, 1, %v3466_v0  ;;  %vm641_vm14 = vcmp.le.f32.partialorder %v3783_v18, 14.0  ;;  %vm640_vm15 = vcmp.le.f32.partialorder %v3788_v19, 14.0  ;;  %v3794_v26 = vld [vmem:[#allocation5 + $0x1b8] sm:$0xff]  }
  0x6d   : > { %2861 = vmatprep.subr.bf16.mxu1 %v3163_v39  ;;  %2794 = vmatpush3.bf16.msra.mxu0 %v3170_v51  ;;  %v3184_v25 = vld [vmem:[#allocation5] sm:$0xff]   ;;  %v539_v31 = vsel %vm490_vm2, 1, %v3466_v0  ;;  %v538_v32 = vsel %vm489_vm3, 1, %v3466_v0  ;;  %vm1028_vm5 = vcmp.eq.f32.partialorder %v3658_v2, 15.0  ;;  %vm1031_vm6 = vcmp.eq.f32.partialorder %v3663_v3, 15.0  ;;  %s2437_s12 = sshll.u32 %s4615_s15, 4  ;;  %s4690_s12 = int_to_ptr.vmem [resolvable:$true] %s2437_s12 }
  0x6e   : > { %2795 = vmatprep.subr.bf16.mxu0 %v3173_v57  ;;  %v1044_v37 = vsel %vm1028_vm5, 1, %v3466_v0  ;;  %vm1030_vm7 = vcmp.eq.f32.partialorder %v3653_v1, 15.0  ;;  %v1047_v38 = vsel %vm1031_vm6, 1, %v3466_v0  ;;  %vm345_vm8 = vcmp.ge.f32.partialorder %v3733_v33, 1.0  ;;  %v3854_v57 = vld [vmem:[%s3638_s8 + $0x68] sm:$0xff]  ;;  %s3389_s26 = scalar_lea.vmem %s4690_s12, 2048 }
  0x6f   : > { %2862 = vmatpush3.bf16.msra.mxu1 %v3164_v42  ;;  %v1046_v39 = vsel %vm1030_vm7, 1, %v3466_v0  ;;  %vm344_vm9 = vcmp.ge.f32.partialorder %v3738_v34, 1.0  ;;  %vm492_vm10 = vcmp.ge.f32.partialorder %v3733_v33, 2.0  ;;  %vm491_vm11 = vcmp.ge.f32.partialorder %v3738_v34, 2.0  ;;  %p3390_p11 = scmp.ne.s32.totalorder %s4690_s12, %s3389_s26  ;;  %s3467_s11 = smov [#allocation8]  }
  0x70   : > { %550 = vperm.xlu1 %3152, %v531_v27   ;;  %547 = vperm.xlu0 %3151, %v530_v28   ;;  %v690_v27 = vsel %vm641_vm14, 1, %v3466_v0  ;;  %v689_v28 = vsel %vm640_vm15, 1, %v3466_v0  ;;  %v541_v42 = vsel %vm492_vm10, 1, %v3466_v0  ;;  %v540_v43 = vsel %vm491_vm11, 1, %v3466_v0  ;;  %s3393_s29 = sshll.u32 %s3467_s11, 4  ;;  %s3394_s29 = int_to_ptr.vmem [resolvable:$false] %s3393_s29 }
  0x71   : > { %2863 = vmatprep.subr.bf16.mxu1 %v3167_v47  ;;  %2796 = vmatpush3.bf16.msra.mxu0 %v3174_v59  ;;  %vm1033_vm12 = vcmp.eq.f32.partialorder %v3679_v7, 15.0  ;;  %vm1032_vm13 = vcmp.eq.f32.partialorder %v3684_v8, 15.0  ;;  %vm1035_vm14 = vcmp.eq.f32.partialorder %v3693_v11, 15.0  ;;  %vm1034_vm15 = vcmp.eq.f32.partialorder %v3698_v12, 15.0  ;;  %p3391_p1 = pnand %p3390_p11, %p4778_p10  ;;  %s3395_s13 = scalar_lea.vmem %s3394_s29, 4096 }
  0x72   : > { %2797 = vmatprep.subr.bf16.mxu0 %v3177_v63  ;;  %v1051_v46 = vsel %vm1035_vm14, 1, %v3466_v0  ;;  %v1050_v47 = vsel %vm1034_vm15, 1, %v3466_v0  ;;  %vm494_vm2 = vcmp.ge.f32.partialorder %v3758_v53, 2.0  ;;  %vm493_vm3 = vcmp.ge.f32.partialorder %v3764_v55, 2.0  ;;  %p3396_p6 = scmp.lt.s32.totalorder %s4690_s12, %s3394_s29  ;;  %p3397_p12 = scmp.lt.s32.totalorder %s3395_s13, %s3389_s26 }
  0x73   : > { %2864 = vmatpush3.bf16.msra.mxu1 %v3168_v48  ;;  %v543_v11 = vsel %vm494_vm2, 1, %v3466_v0  ;;  %v542_v12 = vsel %vm493_vm3, 1, %v3466_v0  ;;  %vm1036_vm5 = vcmp.eq.f32.partialorder %v3720_v24, 15.0  ;;  %vm1039_vm6 = vcmp.eq.f32.partialorder %v3733_v33, 15.0  ;;  %p3392_p2 = pneg %p3391_p1 }
  0x74   : > { %719 = vperm.xlu1 %3152, %v684_v29   ;;  %716 = vperm.xlu0 %3151, %v683_v30   ;;  %v394_v29 = vsel %vm343_vm0, 1, %v3466_v0  ;;  %v393_v30 = vsel %vm342_vm1, 1, %v3466_v0  ;;  %vm347_vm0 = vcmp.ge.f32.partialorder %v3758_v53, 1.0  ;;  %vm346_vm1 = vcmp.ge.f32.partialorder %v3764_v55, 1.0  ;;  %p3398_p7 = por %p3397_p12, %p3396_p6 }
  0x75   : > { %2865 = vmatprep.subr.bf16.mxu1 %v3171_v54  ;;  %2798 = vmatpush3.bf16.msra.mxu0 %v3178_v5  ;;  %v398_v48 = vsel %vm347_vm0, 1, %v3466_v0  ;;  %v397_v49 = vsel %vm346_vm1, 1, %v3466_v0  ;;  %v1052_v51 = vsel %vm1036_vm5, 1, %v3466_v0  ;;  %vm1038_vm7 = vcmp.eq.f32.partialorder %v3738_v34, 15.0  ;;  %v3846_v54 = vld [vmem:[%s3638_s8 + $0x78] sm:$0xff] }
  0x76   : > { %2799 = vmatprep.subr.bf16.mxu0 %v3179_v10  ;;  %v1054_v24 = vsel %vm1038_vm7, 1, %v3466_v0  ;;  %v365_v33 = vrot.slane %v3846_v54, 7  ;;  %v363_v34 = vrot.slane %v3854_v57, 7  ;;  %vm496_vm11 = vcmp.ge.f32.partialorder %v3783_v18, 2.0  ;;  %p3399_p9 = pnand %p3398_p7, %p3392_p2 }
  0x77   : > { %2866 = vmatpush3.bf16.msra.mxu1 %v3172_v56  ;;  %vm1041_vm14 = vcmp.eq.f32.partialorder %v3758_v53, 15.0  ;;  %vm1040_vm15 = vcmp.eq.f32.partialorder %v3764_v55, 15.0  ;;  %vm1043_vm0 = vcmp.eq.f32.partialorder %v3783_v18, 15.0  ;;  %vm1042_vm1 = vcmp.eq.f32.partialorder %v3788_v19, 15.0  ;;  %v3921_v53 = vld [vmem:[%s3638_s8 + $0x20] sm:$0xff] }
  0x78   : > { %411 = vperm.xlu1 %3152, %v388_v35   ;;  %408 = vperm.xlu0 %3151, %v387_v36   ;;  %v3191_v35 = vld [vmem:[#allocation5 + $0x178] sm:$0xff]   ;;  %v1045_v36 = vsel %vm1029_vm4, 1, %v3466_v0  ;;  %vm1037_vm4 = vcmp.eq.f32.partialorder %v3715_v23, 15.0  ;;  %v1055_v23 = vsel %vm1039_vm6, 1, %v3466_v0  ;;  %vm917_vm3 = vcmp.eq.f32.partialorder %v3671_v4, 0.0 }
  0x79   : > { %2867 = vmatprep.subr.bf16.mxu1 %v3175_v61  ;;  %2800 = vmatpush3.bf16.msra.mxu0 %v3180_v13  ;;  %vm772_vm5 = vcmp.le.f32.partialorder %v3671_v4, 13.0  ;;  %vm771_vm6 = vcmp.le.f32.partialorder %v3658_v2, 13.0 }
  0x7a   : > { %2801 = vmatprep.subr.bf16.mxu0 %v3181_v14 }
  0x7b   : > { %2868 = vmatpush3.bf16.msra.mxu1 %v3176_v62 }
  0x7c   : > { %556 = vperm.xlu1 %3152, %v533_v40   ;;  %553 = vperm.xlu0 %3151, %v532_v41   ;;  %v396_v40 = vsel %vm345_vm8, 1, %v3466_v0  ;;  %v395_v41 = vsel %vm344_vm9, 1, %v3466_v0  ;;  %vm349_vm8 = vcmp.ge.f32.partialorder %v3783_v18, 1.0  ;;  %vm348_vm9 = vcmp.ge.f32.partialorder %v3788_v19, 1.0 }
  0x7d   : > { %2802 = vmatpush3.bf16.msra.mxu0 %v3182_v17  ;;  %3013 = vmatprep.subr.bf16.mxu1 %v3794_v26  ;;  %v400_v62 = vsel %vm349_vm8, 1, %v3466_v0  ;;  %v399_v63 = vsel %vm348_vm9, 1, %v3466_v0 }
  0x7e   : > { %2803 = vmatprep.subr.bf16.mxu0 %v3183_v20  ;;  %v1057_v20 = vsel %vm1041_vm14, 1, %v3466_v0 }
  0x80   : > { %725 = vperm.xlu1 %3152, %v686_v44   ;;  %722 = vperm.xlu0 %3151, %v685_v45   ;;  %v1049_v44 = vsel %vm1033_vm12, 1, %v3466_v0  ;;  %v1048_v45 = vsel %vm1032_vm13, 1, %v3466_v0  ;;  %vm495_vm12 = vcmp.ge.f32.partialorder %v3788_v19, 2.0  ;;  %v646_v19 = vrot.slane %v3921_v53, 1 }
  0x81   : > { %2804 = vmatpush3.bf16.msra.mxu0 %v3184_v25  ;;  %v3910_v25 = vld [vmem:[%s3638_s8 + $0x8] sm:$0xff] }
  0x82   : > { %2917 = vmatprep.subr.bf16.mxu0 %v3191_v35 }
  0x84   : > { %417 = vperm.xlu1 %3152, %v390_v50   ;;  %414 = vperm.xlu0 %3151, %v389_v52   ;;  %v1053_v50 = vsel %vm1037_vm4, 1, %v3466_v0  ;;  %v366_v52 = vlaneseq  ;;  %vm916_vm4 = vcmp.eq.f32.partialorder %v3658_v2, 0.0 }
  0x86   : > { %v3851_v56 = vshrl.u32 %v366_v52, 7 }
  0x88   : > { %562 = vperm.xlu1 %3152, %v535_v58   ;;  %559 = vperm.xlu0 %3151, %v534_v60   ;;  %v3857_v58 = vld [vmem:[%s3638_s8 + $0x70] sm:$0xff]  ;;  %vm368_vm10 = vcmp.lt.s32.totalorder %v3851_v56, 1  ;;  %vm513_vm13 = vcmp.lt.s32.totalorder %v3851_v56, 2  ;;  %vm658_vm2 = vcmp.lt.s32.totalorder %v3851_v56, 7 }
  0x89   : > { %v364_v59 = vrot.slane %v3857_v58, 7  ;;  %v511_v10 = vrot.slane %v3857_v58, 6 }
  0x8b   : > { %v3868_v60 = vsel %vm368_vm10, %v364_v59, %v365_v33  ;;  %v3874_v61 = vsel %vm368_vm10, %v363_v34, %v364_v59 }
  0x8c   : > { %731 = vperm.xlu1 %3152, %v688_v6   ;;  %728 = vperm.xlu0 %3151, %v687_v9   ;;  %v2641_v5 = vpack.c.bf16 %v3868_v60, %v3874_v61  ;;  %v512_v6 = vrot.slane %v3846_v54, 6  ;;  %v510_v9 = vrot.slane %v3854_v57, 6  ;;  %v2750_v60 = vld [vmem:[%s3638_s8 + $0x11] ss:$2 sm:$0xff]  ;;  %v2743_v61 = vld [vmem:[%s3638_s8 + $0x20] ss:$2 sm:$0xff] }
  0x8e   : > { %v3890_v13 = vsel %vm513_vm13, %v511_v10, %v512_v6  ;;  %v3896_v14 = vsel %vm513_vm13, %v510_v9, %v511_v10 }
  0x8f   : > { %v2644_v17 = vpack.c.bf16 %v3890_v13, %v3896_v14 }
  0x90   : > { %423 = vperm.xlu1 %3152, %v392_v15   ;;  %420 = vperm.xlu0 %3151, %v391_v16   ;;  %v545_v15 = vsel %vm496_vm11, 1, %v3466_v0  ;;  %v544_v16 = vsel %vm495_vm12, 1, %v3466_v0  ;;  %vm919_vm12 = vcmp.eq.f32.partialorder %v3663_v3, 0.0 }
  0x91   : > { %v935_v59 = vsel %vm919_vm12, 1, %v3466_v0 }
  0x94   : > { %568 = vperm.xlu1 %3152, %v537_v21   ;;  %565 = vperm.xlu0 %3151, %v536_v22   ;;  %v1056_v21 = vsel %vm1040_vm15, 1, %v3466_v0  ;;  %v3907_v22 = vld [vmem:[%s3638_s8] sm:$0xff]  ;;  %vm918_vm15 = vcmp.eq.f32.partialorder %v3653_v1, 0.0 }
  0x95   : > { %v642_v55 = vrot.slane %v3907_v22, 1  ;;  %v3955_v4 = vpack.c.bf16 %v3910_v25, %v3907_v22  ;;  %v350_v52 = vrot.slane %v3907_v22, 7 }
  0x98   : > { %737 = vperm.xlu1 %3152, %v690_v27   ;;  %734 = vperm.xlu0 %3151, %v689_v28   ;;  %v3913_v27 = vld [vmem:[%s3638_s8 + $0x10] sm:$0xff]  ;;  %v3918_v28 = vld [vmem:[%s3638_s8 + $0x18] sm:$0xff] }
  0x99   : > { %v645_v18 = vrot.slane %v3918_v28, 1 }
  0x9c   : > { %429 = vperm.xlu1 %3152, %v394_v29   ;;  %426 = vperm.xlu0 %3151, %v393_v30   ;;  %v643_v29 = vrot.slane %v3910_v25, 1  ;;  %v644_v30 = vrot.slane %v3913_v27, 1 }
  0xa0   : > { %574 = vperm.xlu1 %3152, %v539_v31   ;;  %571 = vperm.xlu0 %3151, %v538_v32   ;;  %v1059_v31 = vsel %vm1043_vm0, 1, %v3466_v0  ;;  %v1058_v32 = vsel %vm1042_vm1, 1, %v3466_v0  ;;  %vm774_vm1 = vcmp.le.f32.partialorder %v3663_v3, 13.0 }
  0xa4   : > { %1064 = vperm.xlu1 %3152, %v1045_v36   ;;  %1061 = vperm.xlu0 %3151, %v1044_v37   ;;  %v672_v37 = vsel %vm658_vm2, %v643_v29, %v644_v30 }
  0xa8   : > { %1070 = vperm.xlu1 %3152, %v1047_v38   ;;  %1067 = vperm.xlu0 %3151, %v1046_v39   ;;  %v673_v38 = vsel %vm658_vm2, %v642_v55, %v643_v29  ;;  %v933_v39 = vsel %vm917_vm3, 1, %v3466_v0  ;;  %vm773_vm3 = vcmp.le.f32.partialorder %v3653_v1, 13.0  ;;  %v497_v29 = vrot.slane %v3907_v22, 6 }
  0xac   : > { %435 = vperm.xlu1 %3152, %v396_v40   ;;  %432 = vperm.xlu0 %3151, %v395_v41   ;;  %v932_v40 = vsel %vm916_vm4, 1, %v3466_v0  ;;  %v670_v41 = vsel %vm658_vm2, %v645_v18, %v646_v19 }
  0xb0   : > { %580 = vperm.xlu1 %3152, %v541_v42   ;;  %577 = vperm.xlu0 %3151, %v540_v43   ;;  %v671_v42 = vsel %vm658_vm2, %v644_v30, %v645_v18  ;;  %v498_v30 = vrot.slane %v3910_v25, 6  ;;  %v4002_v18 = vpack.c.bf16 %v3918_v28, %v3913_v27 }
  0xb2   : > { %v528_v1 = vsel %vm513_vm13, %v497_v29, %v498_v30 }
  0xb4   : > { %1076 = vperm.xlu1 %3152, %v1049_v44   ;;  %1073 = vperm.xlu0 %3151, %v1048_v45   ;;  %v2647_v45 = vpack.c.bf16 %v672_v37, %v673_v38 }
  0xb8   : > { %1082 = vperm.xlu1 %3152, %v1051_v46   ;;  %1079 = vperm.xlu0 %3151, %v1050_v47   ;;  %v3948_v46 = vld [vmem:[%s3638_s8 + $0x28] sm:$0xff]  ;;  %v3951_v47 = vld [vmem:[%s3638_s8 + $0x30] sm:$0xff] }
  0xb9   : > { %v647_v2 = vrot.slane %v3948_v46, 1 }
  0xbb   : > { %v669_v10 = vsel %vm658_vm2, %v646_v19, %v647_v2  ;;  %v823_v19 = vsel %vm774_vm1, 1, %v3466_v0 }
  0xbc   : > { %441 = vperm.xlu1 %3152, %v398_v48   ;;  %438 = vperm.xlu0 %3151, %v397_v49   ;;  %v821_v48 = vsel %vm772_vm5, 1, %v3466_v0  ;;  %v2650_v49 = vpack.c.bf16 %v670_v41, %v671_v42  ;;  %v3188_v41 = vld [vmem:[#allocation5 + $0x1a0] sm:$0xff]  }
  0xc0   : > { %586 = vperm.xlu1 %3152, %v543_v11   ;;  %583 = vperm.xlu0 %3151, %v542_v12   ;;  %v820_v11 = vsel %vm771_vm6, 1, %v3466_v0  ;;  %v648_v12 = vrot.slane %v3951_v47, 1  ;;  %vm921_vm6 = vcmp.eq.f32.partialorder %v3679_v7, 0.0 }
  0xc1   : > { %v937_v42 = vsel %vm921_vm6, 1, %v3466_v0 }
  0xc4   : > { %1088 = vperm.xlu1 %3152, %v1053_v50   ;;  %1085 = vperm.xlu0 %3151, %v1052_v51  }
  0xc8   : > { %1094 = vperm.xlu1 %3152, %v1055_v23   ;;  %1091 = vperm.xlu0 %3151, %v1054_v24   ;;  %v351_v23 = vrot.slane %v3910_v25, 7  ;;  %v3186_v24 = vld [vmem:[#allocation5 + $0x1b0] sm:$0xff]  }
  0xcc   : > { %447 = vperm.xlu1 %3152, %v400_v62   ;;  %444 = vperm.xlu0 %3151, %v399_v63   ;;  %v934_v62 = vsel %vm918_vm15, 1, %v3466_v0  ;;  %v668_v63 = vsel %vm658_vm2, %v647_v2, %v648_v12  ;;  %v352_v2 = vrot.slane %v3913_v27, 7 }
  0xd0   : > { %592 = vperm.xlu1 %3152, %v545_v15   ;;  %589 = vperm.xlu0 %3151, %v544_v16  }
  0xd4   : > { %1100 = vperm.xlu1 %3152, %v1057_v20   ;;  %1097 = vperm.xlu0 %3151, %v1056_v21   ;;  %v383_v20 = vsel %vm368_vm10, %v350_v52, %v351_v23  ;;  %v384_v21 = vsel %vm368_vm10, %v365_v33, %v350_v52  ;;  %v822_v33 = vsel %vm773_vm3, 1, %v3466_v0  ;;  %v3189_v52 = vld [vmem:[#allocation5 + $0x198] sm:$0xff]  }
  0xd7   : > { %v699_v35 = vpop.permute.xlu1 %698  ;;  %v693_v36 = vpop.permute.xlu0 %692 }
  0xd8   : > { %1106 = vperm.xlu1 %3152, %v1059_v31   ;;  %1103 = vperm.xlu0 %3151, %v1058_v32   ;;  %vm739_vm8 = vcmp.eq.s32.totalorder %v693_v36, 1  ;;  %vm741_vm14 = vcmp.eq.s32.totalorder %v699_v35, 1  ;;  %v3995_v31 = vld [vmem:[%s3638_s8 + $0x38] sm:$0xff]  ;;  %v3187_v32 = vld [vmem:[#allocation5 + $0x1a8] sm:$0xff]   ;;  %v2653_v35 = vpack.c.bf16 %v668_v63, %v669_v10  ;;  %v2599_v36 = vpack.c.bf16 %v383_v20, %v384_v21  ;;  %v3284_v20 = vld [vmem:[%s4740_s5 + $0x30] sm:$0xff] }
  0xd9   : > { %v649_v37 = vrot.slane %v3995_v31, 1  ;;  %v3283_v10 = vld [vmem:[%s4740_s5 + $0x38] sm:$0xff] }
  0xda   : > { %vm923_vm6 = vcmp.eq.f32.partialorder %v3283_v10, 0.0 }
  0xdb   : > { %v702_v43 = vpop.permute.xlu1 %701  ;;  %v696_v44 = vpop.permute.xlu0 %695 }
  0xdc   : > { %vm740_vm7 = vcmp.eq.s32.totalorder %v696_v44, 1  ;;  %952 = vperm.xlu1 %3152, %v933_v39   ;;  %949 = vperm.xlu0 %3151, %v932_v40   ;;  %vm742_vm9 = vcmp.eq.s32.totalorder %v702_v43, 1  ;;  %v529_v40 = vsel %vm513_vm13, %v512_v6, %v497_v29  ;;  %v3281_v43 = vld [vmem:[%s4740_s5 + $0x28] sm:$0xff] }
  0xdd   : > { %vm2646_vm11 = vmpackc.low %vm740_vm7, %vm739_vm8  ;;  %vm920_vm7 = vcmp.eq.f32.partialorder %v3684_v8, 0.0  ;;  %v2602_v44 = vpack.c.bf16 %v528_v1, %v529_v40  ;;  %v667_v8 = vsel %vm658_vm2, %v648_v12, %v649_v37  ;;  %v4055_v12 = vpack.c.bf16 %v3948_v46, %v3921_v53  ;;  %v3196_v1 = vld [vmem:[#allocation5 + $0x130] sm:$0xff]   ;;  %v3197_v40 = vld [vmem:[#allocation5 + $0x168] sm:$0xff]  }
  0xde   : > { %2648 = vmatprep.mubr.msk.bf16.mxu1 %vm2646_vm11, %v2647_v45  ;;  %vm2649_vm0 = vmpackc.low %vm742_vm9, %vm741_vm14  ;;  %v936_v6 = vsel %vm920_vm7, 1, %v3466_v0  ;;  %vm776_vm14 = vcmp.le.f32.partialorder %v3281_v43, 13.0  ;;  %v3282_v45 = vld [vmem:[%s4740_s5 + $0x20] sm:$0xff]  ;;  %vm922_vm7 = vcmp.eq.f32.partialorder %v3284_v20, 0.0 }
  0xdf   : > { %v708_v50 = vpop.permute.xlu1 %707  ;;  %v705_v51 = vpop.permute.xlu0 %704  ;;  %1790 = vmatmul.mubr.bf16.vlgmr.msra.gmra.mxu1 %v3955_v4  ;;  %vm775_vm15 = vcmp.le.f32.partialorder %v3282_v45, 13.0 }
  0xe0   : > { %840 = vperm.xlu1 %3152, %v821_v48   ;;  %837 = vperm.xlu0 %3151, %v820_v11   ;;  %vm744_vm4 = vcmp.eq.s32.totalorder %v708_v50, 1  ;;  %vm743_vm5 = vcmp.eq.s32.totalorder %v705_v51, 1  ;;  %v4046_v48 = vld [vmem:[%s3638_s8 + $0x48] sm:$0xff]  ;;  %v353_v50 = vrot.slane %v3918_v28, 7  ;;  %v4051_v51 = vld [vmem:[%s3638_s8 + $0x50] sm:$0xff] }
  0xe1   : > { %2651 = vmatprep.mubr.msk.bf16.mxu1 %vm2649_vm0, %v2650_v49  ;;  %3014 = vmatpush3.bf16.msra.mxu1 %v3794_v26  ;;  %v3998_v26 = vld [vmem:[%s3638_s8 + $0x40] sm:$0xff]  ;;  %vm2652_vm8 = vmpackc.low %vm744_vm4, %vm743_vm5  ;;  %v651_v21 = vrot.slane %v4046_v48, 1  ;;  %v652_v29 = vrot.slane %v4051_v51, 1 }
  0xe2   : > { %3015 = vmatprep.subr.bf16.mxu1 %v3186_v24  ;;  %v650_v38 = vrot.slane %v3998_v26, 1 }
  0xe3   : > { %v3980_v15 = vpop.permute.xlu1 %713  ;;  %v3982_v16 = vpop.permute.xlu0 %710 }
  0xe4   : > { %958 = vperm.xlu1 %3152, %v935_v59   ;;  %955 = vperm.xlu0 %3151, %v934_v62   ;;  %v666_v7 = vsel %vm658_vm2, %v649_v37, %v650_v38  ;;  %v825_v59 = vsel %vm776_vm14, 1, %v3466_v0  ;;  %vm746_vm3 = vcmp.eq.s32.totalorder %v3980_v15, 1  ;;  %vm745_vm4 = vcmp.eq.s32.totalorder %v3982_v16, 1 }
  0xe5   : > { %3016 = vmatpush3.bf16.msra.mxu1 %v3186_v24  ;;  %v3192_v24 = vld [vmem:[#allocation5 + $0x138] sm:$0xff]   ;;  %v824_v62 = vsel %vm775_vm15, 1, %v3466_v0  ;;  %v2656_v63 = vpack.c.bf16 %v666_v7, %v667_v8  ;;  %v499_v37 = vrot.slane %v3913_v27, 6  ;;  %v939_v27 = vsel %vm923_vm6, 1, %v3466_v0  ;;  %v4118_v7 = vld [vmem:[%s3638_s8 + $0x60] sm:$0xff]  ;;  %v3193_v8 = vld [vmem:[#allocation5 + $0x188] sm:$0xff]  }
  0xe6   : > { %3017 = vmatprep.subr.bf16.mxu1 %v3187_v32  ;;  %v664_v15 = vsel %vm658_vm2, %v651_v21, %v652_v29  ;;  %v665_v16 = vsel %vm658_vm2, %v650_v38, %v651_v21  ;;  %v355_v21 = vrot.slane %v3948_v46, 7 }
  0xe7   : > { %v406_v3 = vpop.permute.xlu1 %405  ;;  %v403_v39 = vpop.permute.xlu0 %402  ;;  %1798 = vmatmul.mubr.bf16.gmra.mxu1 %v4002_v18  ;;  %v527_v38 = vsel %vm513_vm13, %v498_v30, %v499_v37  ;;  %v2659_v25 = vpack.c.bf16 %v664_v15, %v665_v16  ;;  %v3285_v30 = vld [vmem:[%s4740_s5 + $0x48] sm:$0xff]  ;;  %v501_v15 = vrot.slane %v3921_v53, 6  ;;  %v502_v16 = vrot.slane %v3948_v46, 6 }
  0xe8   : > { %vm450_vm9 = vcmp.eq.s32.totalorder %v406_v3, 1  ;;  %vm449_vm11 = vcmp.eq.s32.totalorder %v403_v39, 1  ;;  %846 = vperm.xlu1 %3152, %v823_v19   ;;  %843 = vperm.xlu0 %3151, %v822_v33   ;;  %v500_v3 = vrot.slane %v3918_v28, 6  ;;  %v3190_v39 = vld [vmem:[#allocation5 + $0x190] sm:$0xff]  }
  0xe9   : > { %2654 = vmatprep.mubr.msk.bf16.mxu1 %vm2652_vm8, %v2653_v35  ;;  %vm2598_vm12 = vmpackc.low %vm450_vm9, %vm449_vm11  ;;  %3018 = vmatpush3.bf16.msra.mxu1 %v3187_v32  ;;  %v3195_v32 = vld [vmem:[#allocation5 + $0x170] sm:$0xff]   ;;  %v381_v35 = vsel %vm368_vm10, %v352_v2, %v353_v50  ;;  %vm778_vm9 = vcmp.le.f32.partialorder %v3283_v10, 13.0  ;;  %vm777_vm11 = vcmp.le.f32.partialorder %v3284_v20, 13.0  ;;  %v354_v20 = vrot.slane %v3921_v53, 7 }
  0xea   : > { %2600 = vmatprep.mubr.msk.bf16.mxu0 %vm2598_vm12, %v2599_v36  ;;  %3019 = vmatprep.subr.bf16.mxu1 %v3188_v41  ;;  %v382_v36 = vsel %vm368_vm10, %v351_v23, %v352_v2  ;;  %vm2655_vm8 = vmpackc.low %vm746_vm3, %vm745_vm4  ;;  %v938_v23 = vsel %vm922_vm7, 1, %v3466_v0  ;;  %v526_v45 = vsel %vm513_vm13, %v499_v37, %v500_v3  ;;  %v826_v2 = vsel %vm777_vm11, 1, %v3466_v0 }
  0xeb   : > { %v551_v49 = vpop.permute.xlu1 %550  ;;  %v548_v11 = vpop.permute.xlu0 %547  ;;  %vm925_vm3 = vcmp.eq.f32.partialorder %v3285_v30, 0.0 }
  0xec   : > { %vm595_vm0 = vcmp.eq.s32.totalorder %v551_v49, 1  ;;  %vm594_vm1 = vcmp.eq.s32.totalorder %v548_v11, 1  ;;  %964 = vperm.xlu1 %3152, %v937_v42   ;;  %961 = vperm.xlu0 %3151, %v936_v6   ;;  %v4103_v42 = vld [vmem:[%s3638_s8 + $0x58] sm:$0xff]  ;;  %v3198_v49 = vld [vmem:[#allocation5 + $0x128] sm:$0xff]   ;;  %v827_v11 = vsel %vm778_vm9, 1, %v3466_v0  ;;  %v941_v37 = vsel %vm925_vm3, 1, %v3466_v0 }
  0xed   : > { %vm2601_vm5 = vmpackc.low %vm595_vm0, %vm594_vm1  ;;  %3020 = vmatpush3.bf16.msra.mxu1 %v3188_v41  ;;  %v2605_v41 = vpack.c.bf16 %v381_v35, %v382_v36  ;;  %v3199_v35 = vld [vmem:[#allocation5 + $0x160] sm:$0xff]   ;;  %vm780_vm9 = vcmp.le.f32.partialorder %v3285_v30, 13.0  ;;  %v525_v30 = vsel %vm513_vm13, %v500_v3, %v501_v15 }
  0xee   : > { %2603 = vmatmul.mubr.msk.bf16.vlgmr.msra.gmra.mxu0 %vm2601_vm5, %v2602_v44  ;;  %3021 = vmatprep.subr.bf16.mxu1 %v3189_v52  ;;  %v4107_v44 = vpack.c.bf16 %v3995_v31, %v3951_v47  ;;  %v3200_v36 = vld [vmem:[#allocation5 + $0x120] sm:$0xff]  }
  0xef   : > { %v4071_v19 = vpop.permute.xlu1 %719  ;;  %v4073_v33 = vpop.permute.xlu0 %716  ;;  %2918 = vmatpush3.bf16.msra.mxu0 %v3192_v24  ;;  %1806 = vmatmul.mubr.bf16.gmra.mxu1 %v4055_v12  ;;  %v3286_v24 = vld [vmem:[%s4740_s5 + $0x40] sm:$0xff] }
  0xf0   : > { %852 = vperm.xlu1 %3152, %v825_v59   ;;  %849 = vperm.xlu0 %3151, %v824_v62   ;;  %vm748_vm15 = vcmp.eq.s32.totalorder %v4071_v19, 1  ;;  %vm747_vm0 = vcmp.eq.s32.totalorder %v4073_v33, 1  ;;  %vm924_vm4 = vcmp.eq.f32.partialorder %v3286_v24, 0.0  ;;  %v653_v59 = vrot.slane %v4103_v42, 1 }
  0xf1   : > { %2657 = vmatprep.mubr.msk.bf16.mxu1 %vm2655_vm8, %v2656_v63  ;;  %3022 = vmatpush3.bf16.msra.mxu1 %v3189_v52  ;;  %v2608_v52 = vpack.c.bf16 %v526_v45, %v527_v38  ;;  %v654_v62 = vrot.slane %v4118_v7, 1  ;;  %vm2658_vm5 = vmpackc.low %vm748_vm15, %vm747_vm0  ;;  %vm779_vm11 = vcmp.le.f32.partialorder %v3286_v24, 13.0  ;;  %v3287_v38 = vld [vmem:[%s4740_s5 + $0x58] sm:$0xff]  ;;  %v656_v24 = vrot.slane %v3857_v58, 1 }
  0xf2   : > { %2919 = vmatprep.subr.bf16.mxu0 %v3195_v32  ;;  %3023 = vmatprep.subr.bf16.mxu1 %v3190_v39  ;;  %v3194_v32 = vld [vmem:[#allocation5 + $0x180] sm:$0xff]   ;;  %v663_v33 = vsel %vm658_vm2, %v652_v29, %v653_v59  ;;  %v4163_v29 = vld [vmem:[#allocation7 + $0x38] sm:$0xff]   ;;  %v828_v53 = vsel %vm779_vm11, 1, %v3466_v0  ;;  %vm927_vm15 = vcmp.eq.f32.partialorder %v3287_v38, 0.0 }
  0xf3   : > { %v412_v6 = vpop.permute.xlu1 %411  ;;  %v409_v43 = vpop.permute.xlu0 %408  ;;  %2920 = vmatpush3.bf16.msra.mxu0 %v3196_v1  ;;  %v3201_v1 = vld [vmem:[#allocation5 + $0x158] sm:$0xff]   ;;  %v662_v19 = vsel %vm658_vm2, %v653_v59, %v654_v62  ;;  %v3205_v59 = vld [vmem:[#allocation5 + $0x150] sm:$0xff]   ;;  %v943_v28 = vsel %vm927_vm15, 1, %v3466_v0 }
  0xf4   : > { %vm452_vm12 = vcmp.eq.s32.totalorder %v412_v6, 1  ;;  %vm451_vm14 = vcmp.eq.s32.totalorder %v409_v43, 1  ;;  %970 = vperm.xlu1 %3152, %v939_v27   ;;  %2921 = vmatprep.subr.bf16.mxu0 %v3197_v40  ;;  %v4167_v6 = vpack.c.bf16 %v4046_v48, %v3998_v26  ;;  %v2662_v43 = vpack.c.bf16 %v662_v19, %v663_v33  ;;  %v3209_v33 = vld [vmem:[#allocation5 + $0x148] sm:$0xff]  }
  0xf5   : > { %vm2604_vm1 = vmpackc.low %vm452_vm12, %vm451_vm14  ;;  %967 = vperm.xlu0 %3151, %v938_v23   ;;  %3024 = vmatpush3.bf16.msra.mxu1 %v3190_v39  ;;  %v940_v39 = vsel %vm924_vm4, 1, %v3466_v0  ;;  %v379_v23 = vsel %vm368_vm10, %v354_v20, %v355_v21 }
  0xf6   : > { %2606 = vmatprep.mubr.msk.bf16.mxu0 %vm2604_vm1, %v2605_v41  ;;  %3025 = vmatprep.subr.bf16.mxu1 %v3193_v8  ;;  %v380_v41 = vsel %vm368_vm10, %v353_v50, %v354_v20  ;;  %v829_v50 = vsel %vm780_vm9, 1, %v3466_v0 }
  0xf7   : > { %v557_v63 = vpop.permute.xlu1 %556  ;;  %v554_v10 = vpop.permute.xlu0 %553  ;;  %2922 = vmatpush3.bf16.msra.mxu0 %v3198_v49  ;;  %1814 = vmatmul.mubr.bf16.gmra.mxu1 %v4107_v44  ;;  %v2611_v45 = vpack.c.bf16 %v379_v23, %v380_v41  ;;  %v3202_v49 = vld [vmem:[#allocation5 + $0x118] sm:$0xff]   ;;  %v3290_v23 = vld [vmem:[%s4740_s5 + $0x60] sm:$0xff] }
  0xf8   : > { %vm597_vm6 = vcmp.eq.s32.totalorder %v557_v63, 1  ;;  %vm596_vm7 = vcmp.eq.s32.totalorder %v554_v10, 1  ;;  %858 = vperm.xlu1 %3152, %v827_v11   ;;  %2660 = vmatprep.mubr.msk.bf16.mxu1 %vm2658_vm5, %v2659_v25  ;;  %v524_v25 = vsel %vm513_vm13, %v501_v15, %v502_v16 }
  0xf9   : > { %vm2607_vm8 = vmpackc.low %vm597_vm6, %vm596_vm7  ;;  %855 = vperm.xlu0 %3151, %v826_v2   ;;  %3026 = vmatpush3.bf16.msra.mxu1 %v3193_v8  ;;  %v3288_v8 = vld [vmem:[%s4740_s5 + $0x50] sm:$0xff]  ;;  %v2614_v63 = vpack.c.bf16 %v524_v25, %v525_v30  ;;  %vm782_vm6 = vcmp.le.f32.partialorder %v3287_v38, 13.0  ;;  %v3210_v38 = vld [vmem:[#allocation5 + $0x108] sm:$0xff]  }
  0xfa   : > { %2609 = vmatmul.mubr.msk.bf16.gmra.mxu0 %vm2607_vm8, %v2608_v52  ;;  %3027 = vmatprep.subr.bf16.mxu1 %v3194_v32  ;;  %vm926_vm0 = vcmp.eq.f32.partialorder %v3288_v8, 0.0  ;;  %v655_v52 = vrot.slane %v3854_v57, 1  ;;  %vm781_vm7 = vcmp.le.f32.partialorder %v3288_v8, 13.0  ;;  %v831_v19 = vsel %vm782_vm6, 1, %v3466_v0  ;;  %v3213_v8 = vld [vmem:[#allocation5 + $0x140] sm:$0xff]  }
  0xfb   : > { %v726_v40 = vpop.permute.xlu1 %725  ;;  %v723_v27 = vpop.permute.xlu0 %722  ;;  %2923 = vmatprep.subr.bf16.mxu0 %v3199_v35  ;;  %v942_v3 = vsel %vm926_vm0, 1, %v3466_v0 }
  0xfc   : > { %976 = vperm.xlu1 %3152, %v941_v37   ;;  %2924 = vmatpush3.bf16.msra.mxu0 %v3200_v36  ;;  %vm750_vm12 = vcmp.eq.s32.totalorder %v726_v40, 1  ;;  %vm749_vm14 = vcmp.eq.s32.totalorder %v723_v27, 1  ;;  %v661_v35 = vsel %vm658_vm2, %v654_v62, %v655_v52  ;;  %v356_v36 = vrot.slane %v3951_v47, 7  ;;  %v3289_v27 = vld [vmem:[%s4740_s5 + $0x68] sm:$0xff] }
  0xfd   : > { %973 = vperm.xlu0 %3151, %v940_v39   ;;  %2925 = vmatprep.subr.bf16.mxu0 %v3201_v1  ;;  %vm2661_vm1 = vmpackc.low %vm750_vm12, %vm749_vm14  ;;  %v357_v37 = vrot.slane %v3995_v31, 7  ;;  %v3206_v39 = vld [vmem:[#allocation5 + $0x110] sm:$0xff]   ;;  %v4209_v1 = vpack.c.bf16 %v4103_v42, %v4051_v51  ;;  %v830_v62 = vsel %vm781_vm7, 1, %v3466_v0  ;;  %vm929_vm12 = vcmp.eq.f32.partialorder %v3289_v27, 0.0 }
  0xfe   : > { %3028 = vmatpush3.bf16.msra.mxu1 %v3194_v32  ;;  %v660_v32 = vsel %vm658_vm2, %v655_v52, %v656_v24  ;;  %vm928_vm14 = vcmp.eq.f32.partialorder %v3290_v23, 0.0  ;;  %v657_v52 = vrot.slane %v3846_v54, 1 }
  0xff   : > { %v418_v11 = vpop.permute.xlu1 %417  ;;  %v415_v2 = vpop.permute.xlu0 %414  ;;  %3045 = vmatprep.subr.bf16.mxu1 %v4163_v29  ;;  %1822 = vmatmul.mubr.bf16.gmra.mxu1 %v4167_v6  ;;  %v2665_v40 = vpack.c.bf16 %v660_v32, %v661_v35 }
 0x100   : > { %vm454_vm3 = vcmp.eq.s32.totalorder %v418_v11, 1  ;;  %vm453_vm4 = vcmp.eq.s32.totalorder %v415_v2, 1  ;;  %864 = vperm.xlu1 %3152, %v829_v50   ;;  %2663 = vmatprep.mubr.msk.bf16.mxu1 %vm2661_vm1, %v2662_v43  ;;  %v377_v50 = vsel %vm368_vm10, %v356_v36, %v357_v37  ;;  %v378_v43 = vsel %vm368_vm10, %v355_v21, %v356_v36 }
 0x101   : > { %vm2610_vm5 = vmpackc.low %vm454_vm3, %vm453_vm4  ;;  %861 = vperm.xlu0 %3151, %v828_v53   ;;  %2926 = vmatpush3.bf16.msra.mxu0 %v3202_v49  ;;  %v503_v53 = vrot.slane %v3951_v47, 6  ;;  %v945_v49 = vsel %vm929_vm12, 1, %v3466_v0  ;;  %v944_v47 = vsel %vm928_vm14, 1, %v3466_v0  ;;  %v2617_v21 = vpack.c.bf16 %v377_v50, %v378_v43 }
 0x102   : > { %2612 = vmatprep.mubr.msk.bf16.mxu0 %vm2610_vm5, %v2611_v45  ;;  %2927 = vmatprep.subr.bf16.mxu0 %v3205_v59  ;;  %v504_v45 = vrot.slane %v3995_v31, 6  ;;  %vm784_vm3 = vcmp.le.f32.partialorder %v3289_v27, 13.0  ;;  %vm783_vm4 = vcmp.le.f32.partialorder %v3290_v23, 13.0  ;;  %v3214_v59 = vld [vmem:[#allocation5 + $0x100] sm:$0xff]   ;;  %v659_v35 = vsel %vm658_vm2, %v656_v24, %v657_v52 }
 0x103   : > { %v563_v10 = vpop.permute.xlu1 %562  ;;  %v560_v20 = vpop.permute.xlu0 %559  ;;  %v523_v30 = vsel %vm513_vm13, %v502_v16, %v503_v53  ;;  %v833_v46 = vsel %vm784_vm3, 1, %v3466_v0  ;;  %v832_v16 = vsel %vm783_vm4, 1, %v3466_v0  ;;  %v674_v36 = vsel %vm658_vm2, %v657_v52, %v642_v55  ;;  %v3204_v52 = vld [vmem:[#allocation7 + $0x30] sm:$0xff]  }
 0x104   : > { %vm599_vm8 = vcmp.eq.s32.totalorder %v563_v10, 1  ;;  %vm598_vm9 = vcmp.eq.s32.totalorder %v560_v20, 1  ;;  %982 = vperm.xlu1 %3152, %v943_v28   ;;  %v522_v25 = vsel %vm513_vm13, %v503_v53, %v504_v45  ;;  %v4247_v28 = vpack.c.bf16 %v3854_v57, %v4118_v7  ;;  %v3292_v10 = vld [vmem:[%s4740_s5 + $0x70] sm:$0xff]  ;;  %v3216_v57 = vld [vmem:[#allocation7] sm:$0xff]  }
 0x105   : > { %vm2613_vm11 = vmpackc.low %vm599_vm8, %vm598_vm9  ;;  %979 = vperm.xlu0 %3151, %v942_v3   ;;  %2928 = vmatpush3.bf16.msra.mxu0 %v3206_v39  ;;  %v2620_v3 = vpack.c.bf16 %v522_v25, %v523_v30  ;;  %vm930_vm9 = vcmp.eq.f32.partialorder %v3292_v10, 0.0  ;;  %v358_v39 = vrot.slane %v3998_v26, 7  ;;  %v2668_v55 = vpack.c.bf16 %v674_v36, %v659_v35  ;;  %v3208_v35 = vld [vmem:[#allocation7 + $0x20] sm:$0xff]  }
 0x106   : > { %2615 = vmatmul.mubr.msk.bf16.gmra.mxu0 %vm2613_vm11, %v2614_v63  ;;  %2929 = vmatprep.subr.bf16.mxu0 %v3209_v33  ;;  %v3291_v63 = vld [vmem:[%s4740_s5 + $0x78] sm:$0xff]  ;;  %v946_v22 = vsel %vm930_vm9, 1, %v3466_v0  ;;  %v505_v23 = vrot.slane %v3998_v26, 6  ;;  %v507_v25 = vrot.slane %v4051_v51, 6  ;;  %v508_v30 = vrot.slane %v4103_v42, 6 }
 0x107   : > { %v732_v41 = vpop.permute.xlu1 %731  ;;  %v729_v15 = vpop.permute.xlu0 %728  ;;  %1830 = vmatmul.mubr.bf16.gmra.mxu1 %v4209_v1  ;;  %vm931_vm8 = vcmp.eq.f32.partialorder %v3291_v63, 0.0  ;;  %vm786_vm2 = vcmp.le.f32.partialorder %v3291_v63, 13.0  ;;  %v376_v27 = vsel %vm368_vm10, %v357_v37, %v358_v39 }
 0x108   : > { %vm752_vm15 = vcmp.eq.s32.totalorder %v732_v41, 1  ;;  %vm751_vm0 = vcmp.eq.s32.totalorder %v729_v15, 1  ;;  %870 = vperm.xlu1 %3152, %v831_v19   ;;  %v359_v19 = vrot.slane %v4046_v48, 7  ;;  %v947_v24 = vsel %vm931_vm8, 1, %v3466_v0 }
 0x109   : > { %vm2664_vm1 = vmpackc.low %vm752_vm15, %vm751_vm0  ;;  %867 = vperm.xlu0 %3151, %v830_v62   ;;  %2930 = vmatpush3.bf16.msra.mxu0 %v3210_v38  ;;  %vm785_vm15 = vcmp.le.f32.partialorder %v3292_v10, 13.0  ;;  %v506_v41 = vrot.slane %v4046_v48, 6  ;;  %v4283_v15 = vpack.c.bf16 %v3846_v54, %v3857_v58  ;;  %v835_v50 = vsel %vm786_vm2, 1, %v3466_v0 }
 0x10a   : > { %2666 = vmatprep.mubr.msk.bf16.mxu1 %vm2664_vm1, %v2665_v40  ;;  %2931 = vmatprep.subr.bf16.mxu0 %v3213_v8  ;;  %v375_v40 = vsel %vm368_vm10, %v358_v39, %v359_v19  ;;  %v834_v43 = vsel %vm785_vm15, 1, %v3466_v0  ;;  %v521_v48 = vsel %vm513_vm13, %v504_v45, %v505_v23  ;;  %v361_v45 = vrot.slane %v4103_v42, 7 }
 0x10b   : > { %v424_v11 = vpop.permute.xlu1 %423  ;;  %v421_v2 = vpop.permute.xlu0 %420  ;;  %v2623_v53 = vpack.c.bf16 %v375_v40, %v376_v27  ;;  %v520_v26 = vsel %vm513_vm13, %v505_v23, %v506_v41  ;;  %v519_v63 = vsel %vm513_vm13, %v506_v41, %v507_v25  ;;  %v3212_v40 = vld [vmem:[#allocation7 + $0x10] sm:$0xff]  }
 0x10c   : > { %vm456_vm5 = vcmp.eq.s32.totalorder %v424_v11, 1  ;;  %vm455_vm6 = vcmp.eq.s32.totalorder %v421_v2, 1  ;;  %988 = vperm.xlu1 %3152, %v945_v49   ;;  %v2626_v0 = vpack.c.bf16 %v520_v26, %v521_v48  ;;  %v360_v49 = vrot.slane %v4051_v51, 7  ;;  %v3207_v51 = vld [vmem:[#allocation7 + $0x28] sm:$0xff]  }
 0x10d   : > { %vm2616_vm7 = vmpackc.low %vm456_vm5, %vm455_vm6  ;;  %985 = vperm.xlu0 %3151, %v944_v47   ;;  %2932 = vmatpush3.bf16.msra.mxu0 %v3214_v59 }
 0x10e   : > { %2618 = vmatprep.mubr.msk.bf16.mxu0 %vm2616_vm7, %v2617_v21  ;;  %v373_v11 = vsel %vm368_vm10, %v360_v49, %v361_v45  ;;  %v374_v2 = vsel %vm368_vm10, %v359_v19, %v360_v49  ;;  %v3211_v19 = vld [vmem:[#allocation7 + $0x18] sm:$0xff]  }
 0x10f   : > { %v569_v20 = vpop.permute.xlu1 %568  ;;  %v566_v32 = vpop.permute.xlu0 %565  ;;  %1838 = vmatmul.mubr.bf16.gmra.mxu1 %v4247_v28  ;;  %v2629_v59 = vpack.c.bf16 %v373_v11, %v374_v2 }
 0x110   : > { %vm601_vm11 = vcmp.eq.s32.totalorder %v569_v20, 1  ;;  %vm600_vm12 = vcmp.eq.s32.totalorder %v566_v32, 1  ;;  %876 = vperm.xlu1 %3152, %v833_v46  }
 0x111   : > { %vm2619_vm14 = vmpackc.low %vm601_vm11, %vm600_vm12  ;;  %873 = vperm.xlu0 %3151, %v832_v16  }
 0x112   : > { %2621 = vmatmul.mubr.msk.bf16.gmra.mxu0 %vm2619_vm14, %v2620_v3  ;;  %v518_v3 = vsel %vm513_vm13, %v507_v25, %v508_v30 }
 0x113   : > { %v738_v33 = vpop.permute.xlu1 %737  ;;  %v735_v62 = vpop.permute.xlu0 %734  ;;  %v2632_v10 = vpack.c.bf16 %v518_v3, %v519_v63  ;;  %v4345_v3 = vld [vmem:[%s3638_s8 + $0x8] sm:$0xff] }
 0x114   : > { %vm754_vm0 = vcmp.eq.s32.totalorder %v738_v33, 1  ;;  %vm753_vm1 = vcmp.eq.s32.totalorder %v735_v62, 1  ;;  %994 = vperm.xlu1 %3152, %v947_v24   ;;  %v509_v62 = vrot.slane %v4118_v7, 6  ;;  %v788_v63 = vrot.slane %v4345_v3, 2 }
 0x115   : > { %vm2667_vm3 = vmpackc.low %vm754_vm0, %vm753_vm1  ;;  %991 = vperm.xlu0 %3151, %v946_v22  }
 0x116   : > { %2669 = vmatprep.mubr.msk.bf16.mxu1 %vm2667_vm3, %v2668_v55 }
 0x117   : > { %v430_v37 = vpop.permute.xlu1 %429  ;;  %v427_v38 = vpop.permute.xlu0 %426  ;;  %1846 = vmatmul.mubr.bf16.gmra.mxu1 %v4283_v15 }
 0x118   : > { %vm458_vm4 = vcmp.eq.s32.totalorder %v430_v37, 1  ;;  %vm457_vm5 = vcmp.eq.s32.totalorder %v427_v38, 1  ;;  %882 = vperm.xlu1 %3152, %v835_v50   ;;  %v517_v50 = vsel %vm513_vm13, %v508_v30, %v509_v62  ;;  %v2742_v30 = vld [vmem:[%s3638_s8 + $0x10] ss:$2 sm:$0xff] }
 0x119   : > { %vm2622_vm6 = vmpackc.low %vm458_vm4, %vm457_vm5  ;;  %879 = vperm.xlu0 %3151, %v834_v43   ;;  %v3215_v43 = vld [vmem:[#allocation7 + $0x8] sm:$0xff]  }
 0x11a   : > { %2624 = vmatprep.mubr.msk.bf16.mxu0 %vm2622_vm6, %v2623_v53 }
 0x11b   : > { %v575_v54 = vpop.permute.xlu1 %574  ;;  %v572_v58 = vpop.permute.xlu0 %571 }
 0x11c   : > { %vm603_vm7 = vcmp.eq.s32.totalorder %v575_v54, 1  ;;  %vm602_vm8 = vcmp.eq.s32.totalorder %v572_v58, 1 }
 0x11d   : > { %vm2625_vm9 = vmpackc.low %vm603_vm7, %vm602_vm8 }
 0x11e   : > { %2627 = vmatmul.mubr.msk.bf16.gmra.mxu0 %vm2625_vm9, %v2626_v0 }
 0x11f   : > { %v1065_v8 = vpop.permute.xlu1 %1064  ;;  %v1062_v31 = vpop.permute.xlu0 %1061 }
 0x120   : > { %vm1109_vm11 = vcmp.eq.s32.totalorder %v1065_v8, 1  ;;  %vm1108_vm12 = vcmp.eq.s32.totalorder %v1062_v31, 1  ;;  %v2048_v8 = vld [vmem:[%s3638_s8] ss:$2 sm:$0xff]  ;;  %v2749_v31 = vld [vmem:[%s3638_s8 + $0x1] ss:$2 sm:$0xff] }
 0x121   : > { %vm2718_vm14 = vmpackc.low %vm1109_vm11, %vm1108_vm12  ;;  %v2095_v25 = vmax.f32 %v2048_v8, %v2749_v31 }
 0x122   : > { %3029 = vmatprep.mubr.msk.bf16.mxu1 %vm2718_vm14, %v3955_v4 }
 0x123   : > { %v1071_v47 = vpop.permute.xlu1 %1070  ;;  %v1068_v21 = vpop.permute.xlu0 %1067 }
 0x124   : > { %vm1111_vm2 = vcmp.eq.s32.totalorder %v1071_v47, 1  ;;  %vm1110_vm15 = vcmp.eq.s32.totalorder %v1068_v21, 1  ;;  %v2079_v47 = vadd.f32 %v2749_v31, %v2048_v8 }
 0x125   : > { %vm2721_vm0 = vmpackc.low %vm1111_vm2, %vm1110_vm15 }
 0x126   : > { %3030 = vmatmul.mubr.msk.bf16.vlgmr.msra.gmra.mxu1 %vm2721_vm0, %v4002_v18  ;;  %v2087_v2 = vmul.f32 0.5, %v2079_v47  ;;  %v2755_v47 = vld [vmem:[%s3638_s8 + $0x61] ss:$2 sm:$0xff] }
 0x127   : > { %v436_v46 = vpop.permute.xlu1 %435  ;;  %v433_v16 = vpop.permute.xlu0 %432  ;;  %3046 = vmatpush3.bf16.msra.mxu1 %v4163_v29  ;;  %v362_v29 = vrot.slane %v4118_v7, 7 }
 0x128   : > { %vm460_vm1 = vcmp.eq.s32.totalorder %v436_v46, 1  ;;  %vm459_vm3 = vcmp.eq.s32.totalorder %v433_v16, 1  ;;  %3047 = vmatprep.subr.bf16.mxu1 %v3204_v52  ;;  %v2103_v14 = vpack.c.bf16 %v2095_v25, %v2087_v2 }
 0x129   : > { %vm2628_vm4 = vmpackc.low %vm460_vm1, %vm459_vm3  ;;  %v371_v55 = vsel %vm368_vm10, %v362_v29, %v363_v34  ;;  %v372_v33 = vsel %vm368_vm10, %v361_v45, %v362_v29  ;;  %v516_v34 = vsel %vm513_vm13, %v509_v62, %v510_v9  ;;  %v2753_v62 = vld [vmem:[%s3638_s8 + $0x41] ss:$2 sm:$0xff] }
 0x12a   : > { %2630 = vmatprep.mubr.msk.bf16.mxu0 %vm2628_vm4, %v2629_v59  ;;  %v2635_v27 = vpack.c.bf16 %v371_v55, %v372_v33  ;;  %v2638_v53 = vpack.c.bf16 %v516_v34, %v517_v50  ;;  %v2745_v33 = vld [vmem:[%s3638_s8 + $0x40] ss:$2 sm:$0xff] }
 0x12b   : > { %v581_v20 = vpop.permute.xlu1 %580  ;;  %v578_v32 = vpop.permute.xlu0 %577  ;;  %3048 = vmatpush3.bf16.msra.mxu1 %v3204_v52  ;;  %v2080_v52 = vadd.f32 %v2750_v60, %v2742_v30  ;;  %v2083_v50 = vadd.f32 %v2753_v62, %v2745_v33 }
 0x12c   : > { %vm605_vm5 = vcmp.eq.s32.totalorder %v581_v20, 1  ;;  %vm604_vm6 = vcmp.eq.s32.totalorder %v578_v32, 1  ;;  %3049 = vmatprep.subr.bf16.mxu1 %v3207_v51  ;;  %v2096_v32 = vmax.f32 %v2742_v30, %v2750_v60 }
 0x12d   : > { %vm2631_vm7 = vmpackc.low %vm605_vm5, %vm604_vm6  ;;  %v2088_v20 = vmul.f32 0.5, %v2080_v52 }
 0x12e   : > { %2633 = vmatmul.mubr.msk.bf16.gmra.mxu0 %vm2631_vm7, %v2632_v10 }
 0x12f   : > { %v1077_v36 = vpop.permute.xlu1 %1076  ;;  %v1074_v39 = vpop.permute.xlu0 %1073  ;;  %3050 = vmatpush3.bf16.msra.mxu1 %v3207_v51  ;;  %v4349_v51 = vld [vmem:[%s3638_s8 + $0x10] sm:$0xff] }
 0x130   : > { %vm1113_vm8 = vcmp.eq.s32.totalorder %v1077_v36, 1  ;;  %vm1112_vm9 = vcmp.eq.s32.totalorder %v1074_v39, 1  ;;  %3051 = vmatprep.subr.bf16.mxu1 %v3208_v35  ;;  %v789_v10 = vrot.slane %v4349_v51, 2 }
 0x131   : > { %vm2724_vm11 = vmpackc.low %vm1113_vm8, %vm1112_vm9 }
 0x132   : > { %3033 = vmatprep.mubr.msk.bf16.mxu1 %vm2724_vm11, %v4055_v12 }
 0x133   : > { %v1083_v24 = vpop.permute.xlu1 %1082  ;;  %v1080_v22 = vpop.permute.xlu0 %1079  ;;  %3052 = vmatpush3.bf16.msra.mxu1 %v3208_v35 }
 0x134   : > { %vm1115_vm12 = vcmp.eq.s32.totalorder %v1083_v24, 1  ;;  %vm1114_vm14 = vcmp.eq.s32.totalorder %v1080_v22, 1  ;;  %3053 = vmatprep.subr.bf16.mxu1 %v3211_v19  ;;  %v2752_v24 = vld [vmem:[%s3638_s8 + $0x31] ss:$2 sm:$0xff] }
 0x135   : > { %vm2727_vm2 = vmpackc.low %vm1115_vm12, %vm1114_vm14 }
 0x136   : > { %3034 = vmatmul.mubr.msk.bf16.gmra.mxu1 %vm2727_vm2, %v4107_v44 }
 0x137   : > { %v442_v23 = vpop.permute.xlu1 %441  ;;  %v439_v41 = vpop.permute.xlu0 %438  ;;  %3054 = vmatpush3.bf16.msra.mxu1 %v3211_v19  ;;  %v2744_v19 = vld [vmem:[%s3638_s8 + $0x30] ss:$2 sm:$0xff] }
 0x138   : > { %vm462_vm10 = vcmp.eq.s32.totalorder %v442_v23, 1  ;;  %vm461_vm15 = vcmp.eq.s32.totalorder %v439_v41, 1  ;;  %3055 = vmatprep.subr.bf16.mxu1 %v3212_v40 }
 0x139   : > { %vm2634_vm0 = vmpackc.low %vm462_vm10, %vm461_vm15 }
 0x13a   : > { %2636 = vmatprep.mubr.msk.bf16.mxu0 %vm2634_vm0, %v2635_v27  ;;  %v2082_v27 = vadd.f32 %v2752_v24, %v2744_v19 }
 0x13b   : > { %v587_v37 = vpop.permute.xlu1 %586  ;;  %v584_v38 = vpop.permute.xlu0 %583  ;;  %3056 = vmatpush3.bf16.msra.mxu1 %v3212_v40  ;;  %v2104_v40 = vpack.c.bf16 %v2096_v32, %v2088_v20  ;;  %v2748_v20 = vld [vmem:[%s3638_s8 + $0x70] ss:$2 sm:$0xff]  ;;  %v2756_v32 = vld [vmem:[%s3638_s8 + $0x71] ss:$2 sm:$0xff] }
 0x13c   : > { %vm607_vm1 = vcmp.eq.s32.totalorder %v587_v37, 1  ;;  %vm606_vm3 = vcmp.eq.s32.totalorder %v584_v38, 1  ;;  %3057 = vmatprep.subr.bf16.mxu1 %v3215_v43  ;;  %v4370_v38 = vld [vmem:[%s3638_s8 + $0x20] sm:$0xff] }
 0x13d   : > { %vm2637_vm4 = vmpackc.low %vm607_vm1, %vm606_vm3 }
 0x13e   : > { %2639 = vmatmul.mubr.msk.bf16.gmra.mxu0 %vm2637_vm4, %v2638_v53  ;;  %v4366_v53 = vld [vmem:[%s3638_s8 + $0x18] sm:$0xff] }
 0x13f   : > { %v1089_v9 = vpop.permute.xlu1 %1088  ;;  %v1086_v26 = vpop.permute.xlu0 %1085  ;;  %3058 = vmatpush3.bf16.msra.mxu1 %v3215_v43  ;;  %v790_v37 = vrot.slane %v4366_v53, 2 }
 0x140   : > { %vm1117_vm13 = vcmp.eq.s32.totalorder %v1089_v9, 1  ;;  %vm1116_vm5 = vcmp.eq.s32.totalorder %v1086_v26, 1  ;;  %3059 = vmatprep.subr.bf16.mxu1 %v3216_v57  ;;  %v2098_v9 = vmax.f32 %v2744_v19, %v2752_v24  ;;  %v2086_v19 = vadd.f32 %v2756_v32, %v2748_v20 }
 0x141   : > { %vm2730_vm6 = vmpackc.low %vm1117_vm13, %vm1116_vm5 }
 0x142   : > { %3037 = vmatprep.mubr.msk.bf16.mxu1 %vm2730_vm6, %v4167_v6  ;;  %vm803_vm6 = vcmp.lt.s32.totalorder %v3851_v56, 6 }
 0x143   : > { %v1095_v48 = vpop.permute.xlu1 %1094  ;;  %v1092_v0 = vpop.permute.xlu0 %1091  ;;  %3060 = vmatpush3.bf16.msra.mxu1 %v3216_v57  ;;  %v817_v22 = vsel %vm803_vm6, %v788_v63, %v789_v10  ;;  %v791_v57 = vrot.slane %v4370_v38, 2 }
 0x144   : > { %vm1119_vm7 = vcmp.eq.s32.totalorder %v1095_v48, 1  ;;  %vm1118_vm8 = vcmp.eq.s32.totalorder %v1092_v0, 1  ;;  %v2091_v48 = vmul.f32 0.5, %v2083_v50  ;;  %v2099_v0 = vmax.f32 %v2745_v33, %v2753_v62  ;;  %v4398_v62 = vld [vmem:[%s3638_s8 + $0x38] sm:$0xff] }
 0x145   : > { %vm2733_vm9 = vmpackc.low %vm1119_vm7, %vm1118_vm8  ;;  %v815_v31 = vsel %vm803_vm6, %v790_v37, %v791_v57 }
 0x146   : > { %3038 = vmatmul.mubr.msk.bf16.gmra.mxu1 %vm2733_vm9, %v4209_v1  ;;  %v2107_v30 = vpack.c.bf16 %v2099_v0, %v2091_v48  ;;  %v4411_v48 = vld [vmem:[%s3638_s8 + $0x48] sm:$0xff] }
 0x147   : > { %v448_v54 = vpop.permute.xlu1 %447  ;;  %v445_v58 = vpop.permute.xlu0 %444  ;;  %v796_v0 = vrot.slane %v4411_v48, 2 }
 0x148   : > { %vm464_vm11 = vcmp.eq.s32.totalorder %v448_v54, 1  ;;  %vm463_vm12 = vcmp.eq.s32.totalorder %v445_v58, 1  ;;  %v2746_v54 = vld [vmem:[%s3638_s8 + $0x50] ss:$2 sm:$0xff]  ;;  %v2754_v58 = vld [vmem:[%s3638_s8 + $0x51] ss:$2 sm:$0xff] }
 0x149   : > { %vm2640_vm14 = vmpackc.low %vm464_vm11, %vm463_vm12 }
 0x14a   : > { %2642 = vmatprep.mubr.msk.bf16.mxu0 %vm2640_vm14, %v2641_v5  ;;  %v2751_v5 = vld [vmem:[%s3638_s8 + $0x21] ss:$2 sm:$0xff] }
 0x14b   : > { %v593_v49 = vpop.permute.xlu1 %592  ;;  %v590_v45 = vpop.permute.xlu0 %589  ;;  %v2081_v16 = vadd.f32 %v2751_v5, %v2743_v61  ;;  %v2097_v29 = vmax.f32 %v2743_v61, %v2751_v5  ;;  %v4383_v5 = vld [vmem:[%s3638_s8 + $0x28] sm:$0xff] }
 0x14c   : > { %vm609_vm2 = vcmp.eq.s32.totalorder %v593_v49, 1  ;;  %vm608_vm10 = vcmp.eq.s32.totalorder %v590_v45, 1  ;;  %v816_v49 = vsel %vm803_vm6, %v789_v10, %v790_v37  ;;  %v2747_v45 = vld [vmem:[%s3638_s8 + $0x60] ss:$2 sm:$0xff]  ;;  %v792_v52 = vrot.slane %v4383_v5, 2 }
 0x14d   : > { %vm2643_vm15 = vmpackc.low %vm609_vm2, %vm608_vm10  ;;  %v2089_v39 = vmul.f32 0.5, %v2081_v16  ;;  %v2680_v25 = vpack.c.bf16 %v815_v31, %v816_v49  ;;  %v2085_v60 = vadd.f32 %v2755_v47, %v2747_v45  ;;  %v2101_v10 = vmax.f32 %v2747_v45, %v2755_v47 }
 0x14e   : > { %2645 = vmatmul.mubr.msk.bf16.gmra.mxu0 %vm2643_vm15, %v2644_v17  ;;  %v4341_v17 = vld [vmem:[%s3638_s8] sm:$0xff] }
 0x14f   : > { %v1101_v21 = vpop.permute.xlu1 %1100  ;;  %v1098_v11 = vpop.permute.xlu0 %1097  ;;  %v787_v46 = vrot.slane %v4341_v17, 2  ;;  %v2105_v34 = vpack.c.bf16 %v2097_v29, %v2089_v39  ;;  %v814_v39 = vsel %vm803_vm6, %v791_v57, %v792_v52 }
 0x150   : > { %vm1121_vm0 = vcmp.eq.s32.totalorder %v1101_v21, 1  ;;  %vm1120_vm1 = vcmp.eq.s32.totalorder %v1098_v11, 1  ;;  %v2084_v11 = vadd.f32 %v2754_v58, %v2746_v54 }
 0x151   : > { %vm2736_vm3 = vmpackc.low %vm1121_vm0, %vm1120_vm1  ;;  %v818_v55 = vsel %vm803_vm6, %v787_v46, %v788_v63  ;;  %v2093_v63 = vmul.f32 0.5, %v2085_v60 }
 0x152   : > { %3041 = vmatprep.mubr.msk.bf16.mxu1 %vm2736_vm3, %v4247_v28  ;;  %v2674_v41 = vpack.c.bf16 %v817_v22, %v818_v55 }
 0x153   : > { %v1107_v59 = vpop.permute.xlu1 %1106  ;;  %v1104_v13 = vpop.permute.xlu0 %1103  ;;  %v2109_v55 = vpack.c.bf16 %v2101_v10, %v2093_v63 }
 0x154   : > { %vm1123_vm4 = vcmp.eq.s32.totalorder %v1107_v59, 1  ;;  %vm1122_vm13 = vcmp.eq.s32.totalorder %v1104_v13, 1  ;;  %v4387_v59 = vld [vmem:[%s3638_s8 + $0x30] sm:$0xff] }
 0x155   : > { %vm2739_vm5 = vmpackc.low %vm1123_vm4, %vm1122_vm13  ;;  %v793_v13 = vrot.slane %v4387_v59, 2 }
 0x156   : > { %3042 = vmatmul.mubr.msk.bf16.gmra.mxu1 %vm2739_vm5, %v4283_v15 }
 0x157   : > { %v953_v35 = vpop.permute.xlu1 %952  ;;  %v950_v36 = vpop.permute.xlu0 %949  ;;  %3061 = vmatprep.mubr.bf16.mxu1 %v2103_v14  ;;  %v2100_v14 = vmax.f32 %v2746_v54, %v2754_v58  ;;  %v4415_v54 = vld [vmem:[%s3638_s8 + $0x50] sm:$0xff] }
 0x158   : > { %vm997_vm7 = vcmp.eq.s32.totalorder %v953_v35, 1  ;;  %vm996_vm8 = vcmp.eq.s32.totalorder %v950_v36, 1  ;;  %v813_v36 = vsel %vm803_vm6, %v792_v52, %v793_v13  ;;  %v797_v58 = vrot.slane %v4415_v54, 2  ;;  %v4431_v52 = vld [vmem:[%s3638_s8 + $0x68] sm:$0xff] }
 0x159   : > { %vm2670_vm9 = vmpackc.low %vm997_vm7, %vm996_vm8  ;;  %v2686_v22 = vpack.c.bf16 %v813_v36, %v814_v39  ;;  %4760 = vst [vmem:[#allocation12_spill] sm:$0xff] %v4431_v52  ;;  %v4444_v36 = vld [vmem:[%s3638_s8 + $0x78] sm:$0xff] }
 0x15a   : > { %2672 = vmatprep.mubr.msk.bf16.mxu0 %vm2670_vm9, %v3955_v4  ;;  %v2090_v4 = vmul.f32 0.5, %v2082_v27  ;;  %v4402_v27 = vld [vmem:[%s3638_s8 + $0x40] sm:$0xff]  ;;  %4762 = vst [vmem:[#allocation14_spill] sm:$0xff] %v4444_v36  ;;  %v802_v39 = vrot.slane %v4444_v36, 2 }
 0x15b   : > { %v841_v23 = vpop.permute.xlu1 %840  ;;  %v838_v43 = vpop.permute.xlu0 %837 }
 0x15c   : > { %vm885_vm11 = vcmp.eq.s32.totalorder %v841_v23, 1  ;;  %vm884_vm12 = vcmp.eq.s32.totalorder %v838_v43, 1  ;;  %v2106_v21 = vpack.c.bf16 %v2098_v9, %v2090_v4  ;;  %v795_v23 = vrot.slane %v4402_v27, 2 }
 0x15d   : > { %vm2673_vm14 = vmpackc.low %vm885_vm11, %vm884_vm12 }
 0x15e   : > { %3062 = vmatmul.mubr.bf16.vlgmr.msra.gmra.mxu1 %v2104_v40  ;;  %2675 = vmatmul.mubr.msk.bf16.vlgmr.msra.gmra.mxu0 %vm2673_vm14, %v2674_v41  ;;  %v794_v40 = vrot.slane %v4398_v62, 2  ;;  %v2094_v41 = vmul.f32 0.5, %v2086_v19  ;;  %v810_v49 = vsel %vm803_vm6, %v795_v23, %v796_v0 }
 0x15f   : > { %v959_v26 = vpop.permute.xlu1 %958  ;;  %3065 = vmatprep.mubr.bf16.mxu1 %v2105_v34  ;;  %v956_v8 = vpop.permute.xlu0 %955  ;;  %v2102_v34 = vmax.f32 %v2748_v20, %v2756_v32 }
 0x160   : > { %vm999_vm2 = vcmp.eq.s32.totalorder %v959_v26, 1  ;;  %vm998_vm10 = vcmp.eq.s32.totalorder %v956_v8, 1  ;;  %v811_v43 = vsel %vm803_vm6, %v794_v40, %v795_v23  ;;  %v812_v37 = vsel %vm803_vm6, %v793_v13, %v794_v40 }
 0x161   : > { %vm2676_vm15 = vmpackc.low %vm999_vm2, %vm998_vm10  ;;  %v2110_v57 = vpack.c.bf16 %v2102_v34, %v2094_v41  ;;  %v2692_v9 = vpack.c.bf16 %v811_v43, %v812_v37  ;;  %v800_v13 = vrot.slane %v4431_v52, 2 }
 0x162   : > { %2678 = vmatprep.mubr.msk.bf16.mxu0 %vm2676_vm15, %v4002_v18  ;;  %v2092_v18 = vmul.f32 0.5, %v2084_v11  ;;  %v798_v11 = vrot.slane %v4103_v42, 2 }
 0x163   : > { %v847_v2 = vpop.permute.xlu1 %846  ;;  %v844_v61 = vpop.permute.xlu0 %843 }
 0x164   : > { %vm887_vm0 = vcmp.eq.s32.totalorder %v847_v2, 1  ;;  %vm886_vm1 = vcmp.eq.s32.totalorder %v844_v61, 1  ;;  %v2108_v29 = vpack.c.bf16 %v2100_v14, %v2092_v18  ;;  %v799_v2 = vrot.slane %v4118_v7, 2  ;;  %v4435_v18 = vld [vmem:[%s3638_s8 + $0x70] sm:$0xff] }
 0x165   : > { %vm2679_vm3 = vmpackc.low %vm887_vm0, %vm886_vm1  ;;  %4761 = vst [vmem:[#allocation13_spill] sm:$0xff] %v4435_v18  ;;  %v801_v14 = vrot.slane %v4435_v18, 2 }
 0x166   : > { %3066 = vmatmul.mubr.bf16.gmra.mxu1 %v2106_v21  ;;  %2681 = vmatmul.mubr.msk.bf16.gmra.mxu0 %vm2679_vm3, %v2680_v25  ;;  %v807_v60 = vsel %vm803_vm6, %v798_v11, %v799_v2  ;;  %v806_v10 = vsel %vm803_vm6, %v799_v2, %v800_v13 }
 0x167   : > { %v965_v16 = vpop.permute.xlu1 %964  ;;  %3069 = vmatprep.mubr.bf16.mxu1 %v2107_v30  ;;  %v962_v35 = vpop.permute.xlu0 %961 }
 0x168   : > { %vm1001_vm4 = vcmp.eq.s32.totalorder %v965_v16, 1  ;;  %vm1000_vm13 = vcmp.eq.s32.totalorder %v962_v35, 1 }
 0x169   : > { %vm2682_vm5 = vmpackc.low %vm1001_vm4, %vm1000_vm13 }
 0x16a   : > { %2684 = vmatprep.mubr.msk.bf16.mxu0 %vm2682_vm5, %v4055_v12 }
 0x16b   : > { %v853_v24 = vpop.permute.xlu1 %852  ;;  %v850_v33 = vpop.permute.xlu0 %849 }
 0x16c   : > { %vm889_vm7 = vcmp.eq.s32.totalorder %v853_v24, 1  ;;  %vm888_vm8 = vcmp.eq.s32.totalorder %v850_v33, 1  ;;  %v804_v24 = vsel %vm803_vm6, %v801_v14, %v802_v39 }
 0x16d   : > { %vm2685_vm9 = vmpackc.low %vm889_vm7, %vm888_vm8 }
 0x16e   : > { %3070 = vmatmul.mubr.bf16.gmra.mxu1 %v2108_v29  ;;  %2687 = vmatmul.mubr.msk.bf16.gmra.mxu0 %vm2685_vm9, %v2686_v22 }
 0x16f   : > { %v971_v12 = vpop.permute.xlu1 %970  ;;  %3073 = vmatprep.mubr.bf16.mxu1 %v2109_v55 }
 0x170   : > { %vm1003_vm11 = vcmp.eq.s32.totalorder %v971_v12, 1  ;;  %v968_v50 = vpop.permute.xlu0 %967 }
 0x171   : > { %vm1002_vm12 = vcmp.eq.s32.totalorder %v968_v50, 1 }
 0x172   : > { %vm2688_vm14 = vmpackc.low %vm1003_vm11, %vm1002_vm12 }
 0x173   : > { %2690 = vmatprep.mubr.msk.bf16.mxu0 %vm2688_vm14, %v4107_v44  ;;  %v859_v4 = vpop.permute.xlu1 %858  ;;  %v809_v44 = vsel %vm803_vm6, %v796_v0, %v797_v58 }
 0x174   : > { %vm891_vm2 = vcmp.eq.s32.totalorder %v859_v4, 1  ;;  %v856_v26 = vpop.permute.xlu0 %855  ;;  %v2698_v47 = vpack.c.bf16 %v809_v44, %v810_v49 }
 0x175   : > { %vm890_vm10 = vcmp.eq.s32.totalorder %v856_v26, 1 }
 0x176   : > { %vm2691_vm15 = vmpackc.low %vm891_vm2, %vm890_vm10  ;;  %3074 = vmatmul.mubr.bf16.gmra.mxu1 %v2110_v57 }
 0x177   : > { %2693 = vmatmul.mubr.msk.bf16.gmra.mxu0 %vm2691_vm15, %v2692_v9  ;;  %v977_v8 = vpop.permute.xlu1 %976  ;;  %v1308_v9 = vld [vmem:[%s4737_s2] sm:$0xff] }
 0x178   : > { %vm1005_vm0 = vcmp.eq.s32.totalorder %v977_v8, 1  ;;  %v974_v31 = vpop.permute.xlu0 %973 }
 0x179   : > { %vm1004_vm1 = vcmp.eq.s32.totalorder %v974_v31, 1 }
 0x17a   : > { %vm2694_vm3 = vmpackc.low %vm1005_vm0, %vm1004_vm1 }
 0x17b   : > { %2696 = vmatprep.mubr.msk.bf16.mxu0 %vm2694_vm3, %v4167_v6  ;;  %v865_v45 = vpop.permute.xlu1 %864  ;;  %v808_v6 = vsel %vm803_vm6, %v797_v58, %v798_v11 }
 0x17c   : > { %vm893_vm4 = vcmp.eq.s32.totalorder %v865_v45, 1  ;;  %v862_v21 = vpop.permute.xlu0 %861  ;;  %v2704_v7 = vpack.c.bf16 %v807_v60, %v808_v6  ;;  %v1309_v45 = vld [vmem:[%s4737_s2 + $0x8] sm:$0xff] }
 0x17d   : > { %vm892_vm13 = vcmp.eq.s32.totalorder %v862_v21, 1 }
 0x17e   : > { %vm2697_vm5 = vmpackc.low %vm893_vm4, %vm892_vm13 }
 0x17f   : > { %2699 = vmatmul.mubr.msk.bf16.gmra.mxu0 %vm2697_vm5, %v2698_v47  ;;  %v983_v25 = vpop.permute.xlu1 %982 }
 0x180   : > { %vm1007_vm7 = vcmp.eq.s32.totalorder %v983_v25, 1  ;;  %v980_v30 = vpop.permute.xlu0 %979 }
 0x181   : > { %vm1006_vm8 = vcmp.eq.s32.totalorder %v980_v30, 1 }
 0x182   : > { %vm2700_vm9 = vmpackc.low %vm1007_vm7, %vm1006_vm8 }
 0x183   : > { %2702 = vmatprep.mubr.msk.bf16.mxu0 %vm2700_vm9, %v4209_v1  ;;  %v871_v42 = vpop.permute.xlu1 %870  ;;  %v805_v1 = vsel %vm803_vm6, %v800_v13, %v801_v14  ;;  %v1310_v14 = vld [vmem:[%s4737_s2 + $0x10] sm:$0xff] }
 0x184   : > { %vm895_vm11 = vcmp.eq.s32.totalorder %v871_v42, 1  ;;  %v868_v61 = vpop.permute.xlu0 %867  ;;  %v2710_v32 = vpack.c.bf16 %v805_v1, %v806_v10 }
 0x185   : > { %vm894_vm12 = vcmp.eq.s32.totalorder %v868_v61, 1 }
 0x186   : > { %vm2703_vm14 = vmpackc.low %vm895_vm11, %vm894_vm12 }
 0x187   : > { %2705 = vmatmul.mubr.msk.bf16.gmra.mxu0 %vm2703_vm14, %v2704_v7  ;;  %v989_v16 = vpop.permute.xlu1 %988 }
 0x188   : > { %vm1009_vm2 = vcmp.eq.s32.totalorder %v989_v16, 1  ;;  %v986_v63 = vpop.permute.xlu0 %985 }
 0x189   : > { %vm1008_vm10 = vcmp.eq.s32.totalorder %v986_v63, 1 }
 0x18a   : > { %vm2706_vm15 = vmpackc.low %vm1009_vm2, %vm1008_vm10 }
 0x18b   : > { %2708 = vmatprep.mubr.msk.bf16.mxu0 %vm2706_vm15, %v4247_v28  ;;  %v877_v20 = vpop.permute.xlu1 %876  ;;  %v819_v28 = vsel %vm803_vm6, %v802_v39, %v787_v46  ;;  %v1311_v39 = vld [vmem:[%s4737_s2 + $0x18] sm:$0xff] }
 0x18c   : > { %vm897_vm0 = vcmp.eq.s32.totalorder %v877_v20, 1  ;;  %v874_v35 = vpop.permute.xlu0 %873  ;;  %v2716_v55 = vpack.c.bf16 %v819_v28, %v804_v24 }
 0x18d   : > { %vm896_vm1 = vcmp.eq.s32.totalorder %v874_v35, 1 }
 0x18e   : > { %vm2709_vm3 = vmpackc.low %vm897_vm0, %vm896_vm1 }
 0x18f   : > { %2711 = vmatmul.mubr.msk.bf16.gmra.mxu0 %vm2709_vm3, %v2710_v32  ;;  %v995_v29 = vpop.permute.xlu1 %994 }
 0x190   : > { %vm1011_vm4 = vcmp.eq.s32.totalorder %v995_v29, 1  ;;  %v992_v19 = vpop.permute.xlu0 %991 }
 0x191   : > { %vm1010_vm13 = vcmp.eq.s32.totalorder %v992_v19, 1 }
 0x192   : > { %vm2712_vm5 = vmpackc.low %vm1011_vm4, %vm1010_vm13 }
 0x193   : > { %2714 = vmatprep.mubr.msk.bf16.mxu0 %vm2712_vm5, %v4283_v15  ;;  %v883_v22 = vpop.permute.xlu1 %882 }
 0x194   : > { %vm899_vm7 = vcmp.eq.s32.totalorder %v883_v22, 1  ;;  %v880_v33 = vpop.permute.xlu0 %879 }
 0x195   : > { %vm898_vm8 = vcmp.eq.s32.totalorder %v880_v33, 1 }
 0x196   : > { %vm2715_vm9 = vmpackc.low %vm899_vm7, %vm898_vm8 }
 0x197   : > { %2717 = vmatmul.mubr.msk.bf16.gmra.mxu0 %vm2715_vm9, %v2716_v55 }
 0x19f   : > { %v2869_v40 = vpop.f32.mrf.mxu1 }
 0x1a1   : > { %v2870_v23 = vpop.f32.mrf.mxu1 }
 0x1a2   : > { %v2871_v41 = vadd.f32 %v2870_v23, %v2869_v40 }
 0x1a3   : > { %v2872_v34 = vpop.f32.mrf.mxu1 }
 0x1a5   : > { %v2873_v12 = vpop.f32.mrf.mxu1 }
 0x1a6   : > { %v2874_v50 = vadd.f32 %v2873_v12, %v2872_v34 }
 0x1a7   : > { %v2875_v43 = vpop.f32.mrf.mxu1 }
 0x1a9   : > { %v2876_v56 = vpop.f32.mrf.mxu1 }
 0x1aa   : > { %v2877_v46 = vadd.f32 %v2876_v56, %v2875_v43 }
 0x1ab   : > { %v2878_v37 = vpop.f32.mrf.mxu1 }
 0x1ad   : > { %v2879_v4 = vpop.f32.mrf.mxu1 }
 0x1ae   : > { %v2805_v57 = vpop.f32.mrf.mxu0  ;;  %v2880_v15 = vadd.f32 %v2879_v4, %v2878_v37 }
 0x1af   : > { %v2881_v0 = vpop.f32.mrf.mxu1 }
 0x1b0   : > { %v2806_v26 = vpop.f32.mrf.mxu0 }
 0x1b1   : > { %v2807_v58 = vadd.f32 %v2806_v26, %v2805_v57  ;;  %v2882_v31 = vpop.f32.mrf.mxu1  ;;  %v1313_v26 = vld [vmem:[%s4737_s2 + $0x28] sm:$0xff] }
 0x1b2   : > { %v2808_v8 = vpop.f32.mrf.mxu0  ;;  %v2883_v49 = vadd.f32 %v2882_v31, %v2881_v0 }
 0x1b3   : > { %v1695_v44 = vadd.f32 %v2807_v58, %v1308_v9  ;;  %v2884_v21 = vpop.f32.mrf.mxu1 }
 0x1b4   : > { %v2809_v47 = vpop.f32.mrf.mxu0 }
 0x1b5   : > { %v2810_v11 = vadd.f32 %v2809_v47, %v2808_v8  ;;  %v4460_v2 = vadd.f32 %v2871_v41, %v1695_v44  ;;  %v2885_v25 = vpop.f32.mrf.mxu1 }
 0x1b6   : > { %v2886_v60 = vadd.f32 %v2885_v25, %v2884_v21 }
 0x1b7   : > { %v1698_v30 = vadd.f32 %v2810_v11, %v1309_v45  ;;  %v2887_v6 = vpop.f32.mrf.mxu1 }
 0x1b9   : > { %v4462_v42 = vadd.f32 %v2874_v50, %v1698_v30  ;;  %v2888_v61 = vpop.f32.mrf.mxu1  ;;  %v1312_v50 = vld [vmem:[%s4737_s2 + $0x20] sm:$0xff] }
 0x1ba   : > { %v2811_v7 = vpop.f32.mrf.mxu0  ;;  %v2889_v13 = vadd.f32 %v2888_v61, %v2887_v6  ;;  %v1314_v6 = vld [vmem:[%s4737_s2 + $0x30] sm:$0xff] }
 0x1bb   : > { %v2890_v63 = vpop.f32.mrf.mxu1 }
 0x1bc   : > { %v2812_v16 = vpop.f32.mrf.mxu0 }
 0x1bd   : > { %v2813_v1 = vadd.f32 %v2812_v16, %v2811_v7  ;;  %v2891_v20 = vpop.f32.mrf.mxu1 }
 0x1be   : > { %v2814_v10 = vpop.f32.mrf.mxu0  ;;  %v2892_v35 = vadd.f32 %v2891_v20, %v2890_v63 }
 0x1bf   : > { %v1703_v32 = vadd.f32 %v2813_v1, %v1310_v14  ;;  %v2893_v19 = vpop.f32.mrf.mxu1 }
 0x1c0   : > { %v2815_v29 = vpop.f32.mrf.mxu0 }
 0x1c1   : > { %v2816_v24 = vadd.f32 %v2815_v29, %v2814_v10  ;;  %v4470_v28 = vadd.f32 %v2877_v46, %v1703_v32  ;;  %v2894_v22 = vpop.f32.mrf.mxu1  ;;  %v1315_v10 = vld [vmem:[%s4737_s2 + $0x38] sm:$0xff] }
 0x1c2   : > { %v2895_v33 = vadd.f32 %v2894_v22, %v2893_v19 }
 0x1c3   : > { %v1706_v55 = vadd.f32 %v2816_v24, %v1311_v39  ;;  %v2896_v40 = vpop.f32.mrf.mxu1 }
 0x1c5   : > { %v4472_v23 = vadd.f32 %v2880_v15, %v1706_v55  ;;  %v2897_v34 = vpop.f32.mrf.mxu1 }
 0x1c6   : > { %v2817_v41 = vpop.f32.mrf.mxu0  ;;  %v2898_v12 = vadd.f32 %v2897_v34, %v2896_v40 }
 0x1c7   : > { %v2899_v56 = vpop.f32.mrf.mxu1 }
 0x1c8   : > { %v2818_v43 = vpop.f32.mrf.mxu0 }
 0x1c9   : > { %v2819_v37 = vadd.f32 %v2818_v43, %v2817_v41  ;;  %v2900_v4 = vpop.f32.mrf.mxu1 }
 0x1ca   : > { %v2820_v57 = vpop.f32.mrf.mxu0  ;;  %v2901_v9 = vadd.f32 %v2900_v4, %v2899_v56 }
 0x1cb   : > { %v1711_v46 = vadd.f32 %v2819_v37, %v1312_v50  ;;  %v2902_v0 = vpop.f32.mrf.mxu1  ;;  %v1316_v50 = vld [vmem:[%s4737_s2 + $0x40] sm:$0xff] }
 0x1cc   : > { %v2821_v15 = vpop.f32.mrf.mxu0 }
 0x1cd   : > { %v2822_v58 = vadd.f32 %v2821_v15, %v2820_v57  ;;  %v4480_v8 = vadd.f32 %v2883_v49, %v1711_v46  ;;  %v2903_v31 = vpop.f32.mrf.mxu1  ;;  %v1317_v57 = vld [vmem:[%s4737_s2 + $0x48] sm:$0xff] }
 0x1ce   : > { %v2904_v45 = vadd.f32 %v2903_v31, %v2902_v0 }
 0x1cf   : > { %v1714_v44 = vadd.f32 %v2822_v58, %v1313_v26  ;;  %v2905_v47 = vpop.f32.mrf.mxu1 }
 0x1d1   : > { %v4482_v21 = vadd.f32 %v2886_v60, %v1714_v44  ;;  %v2906_v25 = vpop.f32.mrf.mxu1  ;;  %v1318_v44 = vld [vmem:[%s4737_s2 + $0x50] sm:$0xff] }
 0x1d2   : > { %v2823_v11 = vpop.f32.mrf.mxu0  ;;  %v2907_v30 = vadd.f32 %v2906_v25, %v2905_v47 }
 0x1d3   : > { %v2908_v61 = vpop.f32.mrf.mxu1 }
 0x1d4   : > { %v2824_v7 = vpop.f32.mrf.mxu0 }
 0x1d5   : > { %v2825_v14 = vadd.f32 %v2824_v7, %v2823_v11  ;;  %v2909_v63 = vpop.f32.mrf.mxu1 }
 0x1d6   : > { %v2826_v16 = vpop.f32.mrf.mxu0  ;;  %v2910_v1 = vadd.f32 %v2909_v63, %v2908_v61 }
 0x1d7   : > { %v1719_v49 = vadd.f32 %v2825_v14, %v1314_v6  ;;  %v2911_v20 = vpop.f32.mrf.mxu1 }
 0x1d8   : > { %v2827_v60 = vpop.f32.mrf.mxu0 }
 0x1d9   : > { %v2828_v32 = vadd.f32 %v2827_v60, %v2826_v16  ;;  %v4490_v39 = vadd.f32 %v2889_v13, %v1719_v49  ;;  %v2912_v29 = vpop.f32.mrf.mxu1 }
 0x1da   : > { %v4492_v24 = vadd.f32 %v2912_v29, %v2911_v20 }
 0x1db   : > { %v1722_v19 = vadd.f32 %v2828_v32, %v1315_v10  ;;  %v2914_v22 = vpop.f32.mrf.mxu1  ;;  %v1320_v32 = vld [vmem:[%s4737_s2 + $0x60] sm:$0xff] }
 0x1dc   : > { %4763 = vst [vmem:[#allocation15_spill] sm:$0xff] %v4492_v24 }
 0x1dd   : > { %v4494_v55 = vadd.f32 %v2892_v35, %v1722_v19  ;;  %v2915_v41 = vpop.f32.mrf.mxu1 }
 0x1de   : > { %v2829_v40 = vpop.f32.mrf.mxu0  ;;  %v4496_v34 = vadd.f32 %v2915_v41, %v2914_v22 }
 0x1e0   : > { %4764 = vst [vmem:[#allocation16_spill] sm:$0xff] %v4496_v34  ;;  %v2830_v43 = vpop.f32.mrf.mxu0 }
 0x1e1   : > { %v2831_v56 = vadd.f32 %v2830_v43, %v2829_v40 }
 0x1e2   : > { %v2832_v37 = vpop.f32.mrf.mxu0 }
 0x1e3   : > { %v1727_v13 = vadd.f32 %v2831_v56, %v1316_v50 }
 0x1e4   : > { %v2833_v4 = vpop.f32.mrf.mxu0 }
 0x1e5   : > { %v2834_v46 = vadd.f32 %v2833_v4, %v2832_v37  ;;  %v4504_v35 = vadd.f32 %v2895_v33, %v1727_v13  ;;  %v1319_v33 = vld [vmem:[%s4737_s2 + $0x58] sm:$0xff] }
 0x1e6   : > { %v4508_v0 = vpop.f32.mrf.mxu1 }
 0x1e7   : > { %v1730_v26 = vadd.f32 %v2834_v46, %v1317_v57 }
 0x1e8   : > { %v1985_v31 = vpop.f32.mrf.mxu1 }
 0x1e9   : > { %v4506_v15 = vadd.f32 %v2898_v12, %v1730_v26 }
 0x1ea   : > { %v4513_v7 = vpop.f32.mrf.mxu1 }
 0x1ec   : > { %v4520_v63 = vpop.f32.mrf.mxu1 }
 0x1ee   : > { %v2835_v58 = vpop.f32.mrf.mxu0 }
 0x1f0   : > { %v2836_v47 = vpop.f32.mrf.mxu0 }
 0x1f1   : > { %v2837_v11 = vadd.f32 %v2836_v47, %v2835_v58 }
 0x1f2   : > { %v2838_v25 = vpop.f32.mrf.mxu0 }
 0x1f3   : > { %v1735_v6 = vadd.f32 %v2837_v11, %v1318_v44 }
 0x1f4   : > { %v2839_v12 = vpop.f32.mrf.mxu0 }
 0x1f5   : > { %v2840_v61 = vadd.f32 %v2839_v12, %v2838_v25  ;;  %v4518_v14 = vadd.f32 %v2901_v9, %v1735_v6  ;;  %v4567_v6 = vld [vmem:[%s4739_s4] ss:$0 sm:$0xff] }
 0x1f6   : > { %v4524_v10 = vpop.f32.mrf.mxu1 }
 0x1f7   : > { %v1738_v16 = vadd.f32 %v2840_v61, %v1319_v33 }
 0x1f8   : > { %v4526_v60 = vpop.f32.mrf.mxu1 }
 0x1f9   : > { %v4522_v49 = vadd.f32 %v2904_v45, %v1738_v16  ;;  %v1321_v45 = vld [vmem:[%s4737_s2 + $0x68] sm:$0xff] }
 0x1fa   : > { %v4531_v22 = vpop.f32.mrf.mxu1 }
 0x1fc   : > { %v4538_v56 = vpop.f32.mrf.mxu1 }
 0x1fe   : > { %v2841_v20 = vpop.f32.mrf.mxu0 }
 0x200   : > { %v2842_v29 = vpop.f32.mrf.mxu0 }
 0x201   : > { %v2843_v19 = vadd.f32 %v2842_v29, %v2841_v20 }
 0x202   : > { %v2844_v9 = vpop.f32.mrf.mxu0 }
 0x203   : > { %v1743_v40 = vadd.f32 %v2843_v19, %v1320_v32 }
 0x204   : > { %v2845_v41 = vpop.f32.mrf.mxu0 }
 0x205   : > { %v2846_v50 = vadd.f32 %v2845_v41, %v2844_v9  ;;  %v4536_v43 = vadd.f32 %v2907_v30, %v1743_v40 }
 0x206   : > { %v4540_v13 = vpop.f32.mrf.mxu1 }
 0x207   : > { %v1746_v37 = vadd.f32 %v2846_v50, %v1321_v45 }
 0x208   : > { %v4544_v4 = vpop.f32.mrf.mxu1 }
 0x209   : > { %v4542_v57 = vadd.f32 %v2910_v1, %v1746_v37 }
 0x20a   : > { %v4546_v46 = vpop.f32.mrf.mxu1 }
 0x20b   : > { %4765 = vst [vmem:[#allocation17_spill] sm:$0xff] %v4542_v57 }
 0x20c   : > { %v4550_v58 = vpop.f32.mrf.mxu1 }
 0x20e   : > { %v4548_v26 = vpop.f32.mrf.mxu0 }
 0x210   : > { %v4552_v44 = vpop.f32.mrf.mxu0 }
 0x212   : > { %v4558_v11 = vpop.f32.mrf.mxu0 }
 0x214   : > { %v4569_v33 = vpop.f32.mrf.mxu0 }
 0x216   : > { %v4554_v47 = vpop.f32.mrf.mxu1 }
 0x217   : > { %4766 = vst [vmem:[#allocation18_spill] sm:$0xff] %v4554_v47 }
 0x218   : > { %v4556_v30 = vpop.f32.mrf.mxu1 }
 0x21a   : > { %v4560_v25 = vpop.f32.mrf.mxu1 }
 0x21b   : > { %4767 = vst [vmem:[#allocation19_spill] sm:$0xff] %v4560_v25 }
 0x21c   : > { %v4562_v1 = vpop.f32.mrf.mxu1 }
 0x21d   : > { %4768 = vst [vmem:[#allocation20_spill] sm:$0xff] %v4562_v1 }
 0x21e   : > { %v3063_v12 = vpop.f32.mrf.mxu1  ;;  %v2933_v61 = vpop.f32.mrf.mxu0 }
 0x21f   : > { %v2225_v16 = vadd.f32 %v3063_v12, %v4567_v6 }
 0x220   : > { %v2216_v20 = vpop.f32.mrf.mxu1  ;;  %v2934_v29 = vpop.f32.mrf.mxu0 }
 0x221   : > { %v2768_v32 = vmul.f32 -1.442695, %v2225_v16  ;;  %v2217_v19 = vadd.f32 %v4567_v6, %v2216_v20  ;;  %v2935_v9 = vadd.f32 %v2934_v29, %v2933_v61 }
 0x222   : > { %v3064_v40 = vpop.f32.mrf.mxu1  ;;  %v2936_v41 = vpop.f32.mrf.mxu0 }
 0x223   : > { %3217 = vpow2.f32 %v2768_v32  ;;  %v2766_v45 = vmul.f32 -1.442695, %v2217_v19  ;;  %v2228_v50 = vadd.f32 %v3064_v40, %v4567_v6  ;;  %v1889_v37 = vadd.f32 %v2935_v9, %v4460_v2 }
 0x224   : > { %v2219_v36 = vpop.f32.mrf.mxu1  ;;  %v2937_v52 = vpop.f32.mrf.mxu0 }
 0x225   : > { %3219 = vpow2.f32 %v2766_v45  ;;  %v2769_v25 = vmul.f32 -1.442695, %v2228_v50  ;;  %v2220_v12 = vadd.f32 %v4567_v6, %v2219_v36  ;;  %v4576_v18 = vadd.f32 %v1985_v31, %v1889_v37 }
 0x226   : > { %v2938_v16 = vadd.f32 %v2937_v52, %v2936_v41  ;;  %v3067_v47 = vpop.f32.mrf.mxu1  ;;  %v2939_v20 = vpop.f32.mrf.mxu0 }
 0x227   : > { %3221 = vpow2.f32 %v2769_v25  ;;  %v2767_v61 = vmul.f32 -1.442695, %v2220_v12  ;;  %v2241_v32 = vadd.f32 %v3067_v47, %v4567_v6 }
 0x228   : > { %v1892_v29 = vadd.f32 %v2938_v16, %v4462_v42  ;;  %v2232_v19 = vpop.f32.mrf.mxu1  ;;  %v2940_v9 = vpop.f32.mrf.mxu0 }
 0x229   : > { %3223 = vpow2.f32 %v2767_v61  ;;  %v2772_v2 = vmul.f32 -1.442695, %v2241_v32  ;;  %v2233_v40 = vadd.f32 %v4567_v6, %v2232_v19 }
 0x22a   : > { %v4582_v45 = vadd.f32 %v4520_v63, %v1892_v29  ;;  %v3068_v36 = vpop.f32.mrf.mxu1  ;;  %v4584_v31 = vpop.f32.mrf.mxu0 }
 0x22b   : > { %3225 = vpow2.f32 %v2772_v2  ;;  %v2770_v52 = vmul.f32 -1.442695, %v2233_v40  ;;  %v2244_v25 = vadd.f32 %v3068_v36, %v4567_v6 }
 0x22c   : > { %v2235_v41 = vpop.f32.mrf.mxu1  ;;  %v2943_v42 = vpop.f32.mrf.mxu0 }
 0x22d   : > { %3227 = vpow2.f32 %v2770_v52  ;;  %v2773_v47 = vmul.f32 -1.442695, %v2244_v25  ;;  %v2236_v50 = vadd.f32 %v4567_v6, %v2235_v41 }
 0x22e   : > { %v3071_v37 = vpop.f32.mrf.mxu1  ;;  %v2945_v16 = vpop.f32.mrf.mxu0 }
 0x22f   : > { %3229 = vpow2.f32 %v2773_v47  ;;  %v2771_v12 = vmul.f32 -1.442695, %v2236_v50  ;;  %v2257_v63 = vadd.f32 %v3071_v37, %v4567_v6 }
 0x230   : > { %v3218_v61 = vpop.eup %3217  ;;  %v2248_v32 = vpop.f32.mrf.mxu1 }
 0x231   : > { %v2329_v29 = vadd.f32 1.0, %v3218_v61  ;;  %3231 = vpow2.f32 %v2771_v12  ;;  %v2776_v19 = vmul.f32 -1.442695, %v2257_v63  ;;  %v2946_v2 = vpop.f32.mrf.mxu0  ;;  %v2249_v40 = vadd.f32 %v4567_v6, %v2248_v32 }
 0x232   : > { %v3220_v36 = vpop.eup %3219  ;;  %v2947_v52 = vadd.f32 %v2946_v2, %v2945_v16  ;;  %v3072_v25 = vpop.f32.mrf.mxu1 }
 0x233   : > { %3233 = vrcp.f32 %v2329_v29  ;;  %v2327_v34 = vadd.f32 1.0, %v3220_v36  ;;  %v2774_v41 = vmul.f32 -1.442695, %v2249_v40  ;;  %v2948_v24 = vpop.f32.mrf.mxu0  ;;  %v2260_v47 = vadd.f32 %v3072_v25, %v4567_v6 }
 0x234   : > { %v3222_v50 = vpop.eup %3221  ;;  %3235 = vpow2.f32 %v2776_v19  ;;  %v1905_v37 = vadd.f32 %v2947_v52, %v4480_v8  ;;  %v2251_v1 = vpop.f32.mrf.mxu1 }
 0x235   : > { %3237 = vrcp.f32 %v2327_v34  ;;  %v2330_v12 = vadd.f32 1.0, %v3222_v50  ;;  %v2777_v63 = vmul.f32 -1.442695, %v2260_v47  ;;  %v2949_v61 = vpop.f32.mrf.mxu0  ;;  %v2252_v32 = vadd.f32 %v4567_v6, %v2251_v1 }
 0x236   : > { %v3224_v57 = vpop.eup %3223  ;;  %v4594_v16 = vadd.f32 %v4526_v60, %v1905_v37  ;;  %3239 = vpow2.f32 %v2774_v41  ;;  %v2950_v29 = vadd.f32 %v2949_v61, %v2948_v24  ;;  %v3075_v2 = vpop.f32.mrf.mxu1  ;;  %v2941_v34 = vadd.f32 %v2940_v9, %v2939_v20 }
 0x237   : > { %3241 = vrcp.f32 %v2330_v12  ;;  %v2328_v40 = vadd.f32 1.0, %v3224_v57  ;;  %v2775_v36 = vmul.f32 -1.442695, %v2252_v32  ;;  %v2951_v19 = vpop.f32.mrf.mxu0  ;;  %v2273_v8 = vadd.f32 %v3075_v2, %v4567_v6 }
 0x238   : > { %v3226_v52 = vpop.eup %3225  ;;  %3243 = vpow2.f32 %v2777_v63  ;;  %v1908_v25 = vadd.f32 %v2950_v29, %v4482_v21  ;;  %v2264_v47 = vpop.f32.mrf.mxu1  ;;  %v1897_v63 = vadd.f32 %v2941_v34, %v4470_v28  ;;  %v2944_v32 = vadd.f32 %v2943_v42, %v4584_v31 }
 0x239   : > { %3245 = vrcp.f32 %v2328_v40  ;;  %v2333_v1 = vadd.f32 1.0, %v3226_v52  ;;  %v2780_v50 = vmul.f32 -1.442695, %v2273_v8  ;;  %v2952_v60 = vpop.f32.mrf.mxu0  ;;  %v2265_v41 = vadd.f32 %v4567_v6, %v2264_v47 }
 0x23a   : > { %v3228_v24 = vpop.eup %3227  ;;  %v4600_v37 = vadd.f32 %v4538_v56, %v1908_v25  ;;  %3247 = vpow2.f32 %v2775_v36  ;;  %v3076_v57 = vpop.f32.mrf.mxu1  ;;  %v1994_v31 = vadd.f32 %v4508_v0, %v1897_v63  ;;  %v2953_v34 = vadd.f32 %v2952_v60, %v2951_v19 }
 0x23b   : > { %3249 = vrcp.f32 %v2333_v1  ;;  %v2331_v12 = vadd.f32 1.0, %v3228_v24  ;;  %v2778_v61 = vmul.f32 -1.442695, %v2265_v41  ;;  %v2954_v20 = vpop.f32.mrf.mxu0  ;;  %v2276_v9 = vadd.f32 %v3076_v57, %v4567_v6 }
 0x23c   : > { %v3230_v21 = vpop.eup %3229  ;;  %3251 = vpow2.f32 %v2780_v50  ;;  %v2267_v29 = vpop.f32.mrf.mxu1  ;;  %v1900_v41 = vadd.f32 %v2944_v32, %v4472_v23  ;;  %v1913_v60 = vadd.f32 %v2953_v34, %v4490_v39 }
 0x23d   : > { %3253 = vrcp.f32 %v2331_v12  ;;  %v2334_v2 = vadd.f32 1.0, %v3230_v21  ;;  %v2781_v40 = vmul.f32 -1.442695, %v2276_v9  ;;  %v2955_v56 = vpop.f32.mrf.mxu0  ;;  %v2268_v36 = vadd.f32 %v4567_v6, %v2267_v29 }
 0x23e   : > { %v3232_v8 = vpop.eup %3231  ;;  %3255 = vpow2.f32 %v2778_v61  ;;  %v1997_v32 = vadd.f32 %v4513_v7, %v1900_v41  ;;  %v2956_v29 = vadd.f32 %v2955_v56, %v2954_v20 }
 0x23f   : > { %3257 = vrcp.f32 %v2334_v2  ;;  %v2332_v52 = vadd.f32 1.0, %v3232_v8  ;;  %v2779_v25 = vmul.f32 -1.442695, %v2268_v36  ;;  %v2957_v47 = vpop.f32.mrf.mxu0 }
 0x240   : > { %v3234_v1 = vpop.eup %3233  ;;  %3259 = vpow2.f32 %v2781_v40  ;;  %v1916_v41 = vadd.f32 %v2956_v29, %v4494_v55 }
 0x241   : > { %v3236_v28 = vpop.eup %3235  ;;  %v2377_v42 = vmul.f32 %v4349_v51, %v3234_v1  ;;  %3261 = vrcp.f32 %v2332_v52  ;;  %v2958_v50 = vpop.f32.mrf.mxu0 }
 0x242   : > { %v3238_v6 = vpop.eup %3237  ;;  %v2337_v24 = vadd.f32 1.0, %v3236_v28  ;;  %3263 = vpow2.f32 %v2779_v25  ;;  %v2959_v57 = vadd.f32 %v2958_v50, %v2957_v47 }
 0x243   : > { %v3240_v12 = vpop.eup %3239  ;;  %v2375_v61 = vmul.f32 %v4341_v17, %v3238_v6  ;;  %v2393_v9 = vadd.f32 %v2377_v42, %v1994_v31  ;;  %v2960_v21 = vpop.f32.mrf.mxu0 }
 0x244   : > { %v3242_v23 = vpop.eup %3241  ;;  %3265 = vrcp.f32 %v2337_v24  ;;  %v2335_v0 = vadd.f32 1.0, %v3240_v12  ;;  %v1921_v51 = vadd.f32 %v2959_v57, %v4504_v35  ;;  %v2013_v57 = vadd.f32 %v4531_v22, %v1916_v41 }
 0x245   : > { %v3244_v63 = vpop.eup %3243  ;;  %v2391_v19 = vadd.f32 %v2375_v61, %v4576_v18  ;;  %2409 = vst [vmem:[%s4615_s15 + $0x10] sm:$0xff] %v2393_v9  ;;  %v2378_v17 = vmul.f32 %v4366_v53, %v3242_v23  ;;  %v2961_v2 = vpop.f32.mrf.mxu0 }
 0x246   : > { %v3246_v7 = vpop.eup %3245  ;;  %3267 = vrcp.f32 %v2335_v0  ;;  %v2338_v40 = vadd.f32 1.0, %v3244_v63  ;;  %v4621_v35 = vadd.f32 %v4544_v4, %v1921_v51  ;;  %v2962_v18 = vadd.f32 %v2961_v2, %v2960_v21 }
 0x247   : > { %v3248_v36 = vpop.eup %3247  ;;  %2407 = vst [vmem:[%s4615_s15] sm:$0xff] %v2391_v19  ;;  %v2376_v8 = vmul.f32 %v4345_v3, %v3246_v7  ;;  %v2394_v52 = vadd.f32 %v2378_v17, %v1997_v32  ;;  %v2963_v25 = vpop.f32.mrf.mxu0  ;;  %v2010_v4 = vadd.f32 %v4524_v10, %v1913_v60  ;;  %v1322_v17 = vld [vmem:[%s4737_s2 + $0x70] sm:$0xff] }
 0x248   : > { %v3250_v47 = vpop.eup %3249  ;;  %3269 = vrcp.f32 %v2338_v40  ;;  %v2336_v53 = vadd.f32 1.0, %v3248_v36  ;;  %v1924_v39 = vadd.f32 %v2962_v18, %v4506_v15  ;;  %v2852_v18 = vadd.f32 %v4569_v33, %v4558_v11  ;;  %v4769_v33 = vld [vmem:[#allocation17_spill] sm:$0xff] }
 0x249   : > { %v3252_v20 = vpop.eup %3251  ;;  %v2392_v56 = vadd.f32 %v2376_v8, %v4582_v45  ;;  %2410 = vst [vmem:[%s4615_s15 + $0x18] sm:$0xff] %v2394_v52  ;;  %v2381_v1 = vmul.f32 %v4387_v59, %v3250_v47  ;;  %v2964_v28 = vpop.f32.mrf.mxu0 }
 0x24a   : > { %v3254_v3 = vpop.eup %3253  ;;  %3271 = vrcp.f32 %v2336_v53  ;;  %v2341_v31 = vadd.f32 1.0, %v3252_v20  ;;  %v4632_v42 = vadd.f32 %v4550_v58, %v1924_v39  ;;  %v2965_v34 = vadd.f32 %v2964_v28, %v2963_v25 }
 0x24b   : > { %v3256_v15 = vpop.eup %3255  ;;  %2408 = vst [vmem:[%s4615_s15 + $0x8] sm:$0xff] %v2392_v56  ;;  %v2379_v45 = vmul.f32 %v4370_v38, %v3254_v3  ;;  %v2397_v50 = vadd.f32 %v2381_v1, %v2010_v4  ;;  %v2966_v6 = vpop.f32.mrf.mxu0  ;;  %v4770_v1 = vld [vmem:[#allocation20_spill] sm:$0xff] }
 0x24c   : > { %v3258_v10 = vpop.eup %3257  ;;  %v2339_v59 = vadd.f32 1.0, %v3256_v15  ;;  %3273 = vrcp.f32 %v2341_v31  ;;  %v1929_v38 = vadd.f32 %v2965_v34, %v4518_v14 }
 0x24d   : > { %v3260_v24 = vpop.eup %3259  ;;  %v2395_v55 = vadd.f32 %v2379_v45, %v4594_v16  ;;  %2413 = vst [vmem:[%s4615_s15 + $0x30] sm:$0xff] %v2397_v50  ;;  %v2382_v58 = vmul.f32 %v4398_v62, %v3258_v10  ;;  %v2967_v12 = vpop.f32.mrf.mxu0  ;;  %v2849_v62 = vadd.f32 %v4552_v44, %v4548_v26  ;;  %v4772_v50 = vld [vmem:[#allocation16_spill] sm:$0xff] }
 0x24e   : > { %v3262_v61 = vpop.eup %3261  ;;  %3275 = vrcp.f32 %v2339_v59  ;;  %v2342_v9 = vadd.f32 1.0, %v3260_v24  ;;  %v2968_v21 = vadd.f32 %v2967_v12, %v2966_v6  ;;  %v4773_v24 = vld [vmem:[#allocation18_spill] sm:$0xff] }
 0x24f   : > { %v3264_v23 = vpop.eup %3263  ;;  %2411 = vst [vmem:[%s4615_s15 + $0x20] sm:$0xff] %v2395_v55  ;;  %v2380_v32 = vmul.f32 %v4383_v5, %v3262_v61  ;;  %v2398_v0 = vadd.f32 %v2382_v58, %v2013_v57  ;;  %v2969_v16 = vpop.f32.mrf.mxu0  ;;  %v2026_v5 = vadd.f32 %v4540_v13, %v1929_v38  ;;  %v1751_v40 = vadd.f32 %v2849_v62, %v1322_v17  ;;  %v4774_v57 = vld [vmem:[#allocation13_spill] sm:$0xff] }
 0x250   : > { %v2340_v51 = vadd.f32 1.0, %v3264_v23  ;;  %3277 = vrcp.f32 %v2342_v9  ;;  %v1932_v19 = vadd.f32 %v2968_v21, %v4522_v49  ;;  %v4775_v9 = vld [vmem:[#allocation12_spill] sm:$0xff] }
 0x251   : > { %v3266_v63 = vpop.eup %3265  ;;  %v2396_v22 = vadd.f32 %v2380_v32, %v4600_v37  ;;  %2414 = vst [vmem:[%s4615_s15 + $0x38] sm:$0xff] %v2398_v0  ;;  %v2970_v14 = vpop.f32.mrf.mxu0  ;;  %v4776_v0 = vld [vmem:[#allocation19_spill] sm:$0xff] }
 0x252   : > { %3279 = vrcp.f32 %v2340_v51  ;;  %v2385_v60 = vmul.f32 %v4415_v54, %v3266_v63  ;;  %v2971_v29 = vadd.f32 %v2970_v14, %v2969_v16  ;;  %v2029_v13 = vadd.f32 %v4546_v46, %v1932_v19  ;;  %v1323_v54 = vld [vmem:[%s4737_s2 + $0x78] sm:$0xff]  ;;  %v4777_v51 = vld [vmem:[#allocation14_spill] sm:$0xff] }
 0x253   : > { %v3268_v26 = vpop.eup %3267  ;;  %2412 = vst [vmem:[%s4615_s15 + $0x28] sm:$0xff] %v2396_v22  ;;  %v2972_v44 = vpop.f32.mrf.mxu0  ;;  %v1754_v20 = vadd.f32 %v2852_v18, %v1323_v54 }
 0x254   : > { %v2383_v37 = vmul.f32 %v4402_v27, %v3268_v26  ;;  %v2401_v2 = vadd.f32 %v2385_v60, %v2026_v5  ;;  %v1937_v49 = vadd.f32 %v2971_v29, %v4536_v43  ;;  %v3307_v27 = vld [vmem:[%s3638_s8 + $0x58] sm:$0xff] }
 0x255   : > { %v3270_v7 = vpop.eup %3269  ;;  %v2973_v36 = vpop.f32.mrf.mxu0  ;;  %v1851_v6 = vadd.f32 %v4772_v50, %v1754_v20 }
 0x256   : > { %v2399_v8 = vadd.f32 %v2383_v37, %v4621_v35  ;;  %2417 = vst [vmem:[%s4615_s15 + $0x50] sm:$0xff] %v2401_v2  ;;  %v2386_v52 = vmul.f32 %v3307_v27, %v3270_v7  ;;  %v2034_v43 = vadd.f32 %v4556_v30, %v1937_v49  ;;  %v2974_v25 = vadd.f32 %v2973_v36, %v2972_v44  ;;  %v4771_v30 = vld [vmem:[#allocation15_spill] sm:$0xff] }
 0x257   : > { %v3272_v47 = vpop.eup %3271  ;;  %v2975_v53 = vpop.f32.mrf.mxu0  ;;  %v1848_v28 = vadd.f32 %v4771_v30, %v1751_v40 }
 0x258   : > { %2415 = vst [vmem:[%s4615_s15 + $0x40] sm:$0xff] %v2399_v8  ;;  %v2384_v46 = vmul.f32 %v4411_v48, %v3272_v47  ;;  %v2402_v11 = vadd.f32 %v2386_v52, %v2029_v13  ;;  %v1940_v39 = vadd.f32 %v2974_v25, %v4769_v33  ;;  %v3308_v48 = vld [vmem:[%s3638_s8 + $0x60] sm:$0xff]  ;;  %s2788_s8 = sshll.u32 %s3526_s25, 11  ;;  %s2424_s25 = scalar_lea.sflag [#allocation4], %s3632_s9 }
 0x259   : > { %v2976_v56 = vpop.f32.mrf.mxu0  ;;  %v3274_v35 = vpop.eup %3273  ;;  %s4688_s18 = scalar_lea.hbm %s4741_s6, %s2788_s8 }
 0x25a   : > { %v2400_v4 = vadd.f32 %v2384_v46, %v4632_v42  ;;  %2418 = vst [vmem:[%s4615_s15 + $0x58] sm:$0xff] %v2402_v11  ;;  %v2037_v41 = vadd.f32 %v4770_v1, %v1940_v39  ;;  %v2977_v3 = vadd.f32 %v2976_v56, %v2975_v53  ;;  %v2389_v58 = vmul.f32 %v4774_v57, %v3274_v35 }
 0x25b   : > { %v3276_v31 = vpop.eup %3275  ;;  %v2978_v34 = vpop.f32.mrf.mxu0 }
 0x25c   : > { %2416 = vst [vmem:[%s4615_s15 + $0x48] sm:$0xff] %v2400_v4  ;;  %v2387_v15 = vmul.f32 %v3308_v48, %v3276_v31  ;;  %v1945_v45 = vadd.f32 %v2977_v3, %v1848_v28 }
 0x25d   : > { %v2979_v10 = vpop.f32.mrf.mxu0  ;;  %v3278_v42 = vpop.eup %3277 }
 0x25e   : > { %v2403_v59 = vadd.f32 %v2387_v15, %v2034_v43  ;;  %v2042_v55 = vadd.f32 %v4773_v24, %v1945_v45  ;;  %v2980_v12 = vadd.f32 %v2979_v10, %v2978_v34  ;;  %v2390_v63 = vmul.f32 %v4777_v51, %v3278_v42 }
 0x25f   : > { %v3280_v61 = vpop.eup %3279 }
 0x260   : > { %2419 = vst [vmem:[%s4615_s15 + $0x60] sm:$0xff] %v2403_v59  ;;  %v2388_v38 = vmul.f32 %v4775_v9, %v3280_v61  ;;  %v2405_v21 = vadd.f32 %v2389_v58, %v2042_v55  ;;  %v1948_v23 = vadd.f32 %v2980_v12, %v1851_v6 }
 0x262   : > { %v2404_v32 = vadd.f32 %v2388_v38, %v2037_v41  ;;  %2421 = vst [vmem:[%s4615_s15 + $0x70] sm:$0xff] %v2405_v21  ;;  %v2045_v16 = vadd.f32 %v4776_v0, %v1948_v23 }
 0x264   : > { %2420 = vst [vmem:[%s4615_s15 + $0x68] sm:$0xff] %v2404_v32  ;;  %v2406_v62 = vadd.f32 %v2390_v63, %v2045_v16 }
 0x266   : > { %2422 = vst [vmem:[%s4615_s15 + $0x78] sm:$0xff] %v2406_v62 }
 0x267   : > { %3402 = shalt.err (!%p3399_p9)
}
 0x268   : > { %s3403_s15 = scalar_lea.hbm %s4688_s18, 2048  ;;  %s3407_s27 = scalar_lea.hbm %s4741_s6, 4096 }
 0x269   : > { %p3404_p13 = scmp.ne.s32.totalorder %s4688_s18, %s3403_s15  ;;  %p3408_p4 = scmp.lt.s32.totalorder %s4688_s18, %s4741_s6 }
 0x26a   : > { %p3409_p8 = scmp.lt.s32.totalorder %s3407_s27, %s3403_s15 }
 0x26b   : > { %p3405_p5 = pnand %p3404_p13, %p4778_p10 }
 0x26c   : > { %p3410_p3 = por %p3409_p8, %p3408_p4 }
 0x26d   : > { %p3406_p0 = pneg %p3405_p5 }
 0x26f   : > { %p3411_p11 = pnand %p3410_p3, %p3406_p0 }
 0x271   : > { %3414 = shalt.err (!%p3411_p11)
}
 0x272   : > { %s3468_s14 = smov 128   ;;  %s3469_s20 = smov 8  }
 0x273   : > { %3087 = dma.vmem_to_hbm [thread:$0]  (%p4778_p10), %s4690_s12, 2048, %s4688_s18, %s2424_s25, %s3468_s14, %s3468_s14, %s3469_s20  }
 0x274 PF: > { %s2452_s26 = sand.u32 1, %s3445_s21   ;;  %p4779_p1 = scmp.ne.s32.totalorder %s4750_s28, 0 }
 0x275   : > { %p4780_p2 = scmp.ge.s32.totalorder %s3457_s24, 2  ;;  %s2453_s11 = scalar_lea.sflag [#allocation4], %s2452_s26 }
 0x277   : > { %p3101_p6 = pnand %p4780_p2, %p4779_p1 }
 0x279   : > { %p3102_p12 = pneg %p3101_p6 }
 0x27b   : > { %3440 = dma.done.wait (%p3102_p12), %s2453_s11, 2048  }
 0x27c   : > { %3442 = vsyncadd (%p3102_p12), %s2453_s11, 4294965248  ;;  %p20_p7 = scmp.ge.s32.totalorder %s3577_s19, 4   ;;  %s4781_s21 = smov %s3449_s22 }
 0x27d   : > { %s4782_s22 = smov %s3453_s23  ;;  %s4783_s23 = smov %s3593_s7 }
 0x27e   : > { %s4784_s24 = smov %s3577_s19  ;;  %22 = sbr.rel (!%p20_p7) target bundleno = 6 (0x6), region = 112 }
 0x283   :  { %2458 = vsyncpa [#allocation3], 1 }
 0x284   :  { %2460 = vsyncpa [#allocation3 + $0x1], 1 }
 0x285   :  { %2461 = vsyncpa [#allocation6], 1 }
 0x286   :  { %2462 = vsyncpa [#allocation4], 1 }
 0x287   :  { %2464 = vsyncpa [#allocation4 + $0x1], 1 }

</bundles_post_ra>
